<compile_context>
chip_gen: v7x
topology: tpu7x:2x2x1
jax: 0.10.0
libtpu: 0.0.40
codegen_flags: <defaults>
</compile_context>

<pallas_src>
import functools

import jax
import jax.numpy as jnp
from jax import lax
from jax.experimental import pallas as pl
from jax.experimental.pallas import tpu as pltpu


def _round_up(x, m):
    return (x + m - 1) // m * m


def _sigmoid_tanh(v):
    # sigmoid(x) = 0.5 * tanh(0.5 * x) + 0.5  -> single EUP transcendental.
    return 0.5 * jnp.tanh(0.5 * v) + 0.5


def _tpu_tuning():
    """Per-generation tile / VMEM policy (safe defaults if detection fails)."""
    kind = ""
    try:
        kind = jax.devices()[0].device_kind.lower()
    except Exception:
        pass
    if "v7" in kind:
        # 2 TensorCores, 64 MiB VMEM: split batch across cores, tighter budget.
        return dict(bt_cap=128, tc_cap=8, vmem_limit=32 * 1024 * 1024,
                    split_batch=True)
    if "v6" in kind:
        # 256-wide MXU, 128 MiB VMEM: bigger batch tiles and time chunks.
        return dict(bt_cap=256, tc_cap=16, vmem_limit=48 * 1024 * 1024,
                    split_batch=False)
    # v5e / unknown.
    return dict(bt_cap=128, tc_cap=16, vmem_limit=48 * 1024 * 1024,
                split_batch=False)


# --------------------------------------------------------------------------
# Fused kernel: per time chunk -> one big x-projection matmul into VMEM,
# then the serial LSTM recurrence; the final Linear is fused into the last
# time chunk.  Grid = (batch_tiles [parallel], time_chunks [arbitrary]).
# --------------------------------------------------------------------------
def _lstm_kernel(x_ref, wih_ref, bias_ref, whh_ref, wfc_ref, bfc_ref,
                 out_ref, gx_sc, h_sc, c_sc, *, seq_len, mask_tail):
    # x_ref  : (1, TC*BT, I) bf16   time-major rows for this (b, t) chunk
    # wih_ref: (I, 4*Hp) bf16       bias_ref: (1, 4*Hp) f32 (b_ih + b_hh)
    # whh_ref: (Hp, 4*Hp) bf16      wfc_ref : (Hp, Cp) bf16   bfc_ref: (1, Cp)
    # out_ref: (BT, Cp) f32         written only on the last time chunk
    # gx_sc  : (TC*BT, 4*Hp) f32    chunk gate pre-activations (VMEM only)
    # h_sc/c_sc: (BT, Hp) f32       recurrent state, persists across chunks
    t_chunk = pl.program_id(1)
    n_chunks = pl.num_programs(1)
    Hp = whh_ref.shape[0]
    BT = h_sc.shape[0]
    TC = gx_sc.shape[0] // BT

    @pl.when(t_chunk == 0)
    def _():
        h_sc[...] = jnp.zeros_like(h_sc)
        c_sc[...] = jnp.zeros_like(c_sc)

    # Fused input projection for the whole chunk: one well-shaped MXU matmul.
    gx_sc[...] = (
        jnp.dot(x_ref[0], wih_ref[...], preferred_element_type=jnp.float32)
        + bias_ref[...]
    )

    whh = whh_ref[...]

    def step(k, carry):
        h, c = carry
        row = pl.multiple_of(k * BT, BT)
        g = gx_sc[pl.ds(row, BT), :] + jnp.dot(
            h.astype(jnp.bfloat16), whh, preferred_element_type=jnp.float32)
        # Gate slabs are 128-lane aligned (Hp multiple of 128): free slices.
        i_g = _sigmoid_tanh(g[:, 0 * Hp:1 * Hp])
        f_g = _sigmoid_tanh(g[:, 1 * Hp:2 * Hp])
        g_g = jnp.tanh(g[:, 2 * Hp:3 * Hp])
        o_g = _sigmoid_tanh(g[:, 3 * Hp:4 * Hp])
        c_new = f_g * c + i_g * g_g
        h_new = o_g * jnp.tanh(c_new)
        if mask_tail:
            valid = (t_chunk * TC + k) < seq_len
            h_new = jnp.where(valid, h_new, h)
            c_new = jnp.where(valid, c_new, c)
        return h_new, c_new

    h, c = lax.fori_loop(0, TC, step, (h_sc[...], c_sc[...]), unroll=True)
    h_sc[...] = h
    c_sc[...] = c

    @pl.when(t_chunk == n_chunks - 1)
    def _():
        out_ref[...] = (
            jnp.dot(h.astype(jnp.bfloat16), wfc_ref[...],
                    preferred_element_type=jnp.float32)
            + bfc_ref[...]
        )


# --------------------------------------------------------------------------
# Wrapper: padding / layout plumbing + the single pallas_call.
# --------------------------------------------------------------------------
def lstm_model_forward(x_btI, params):
    """x_btI: (B, T, I) batch-first (like PyTorch). Returns (B, num_classes)."""
    wih, bias, whh, wfc, bfc = (params["wih"], params["bias"], params["whh"],
                                params["wfc"], params["bfc"])
    B, T, I = x_btI.shape
    Hp = params["hidden_pad"]
    Cp = params["classes_pad"]
    C = params["classes"]
    G = 4 * Hp

    tune = _tpu_tuning()

    # Batch: pad to >= 8 sublanes, tile so v7x gets >= 2 tiles (both cores).
    Bp0 = _round_up(max(B, 8), 8)
    if tune["split_batch"] and Bp0 >= 16:
        BT = min(tune["bt_cap"], _round_up((Bp0 + 1) // 2, 8))
    else:
        BT = min(tune["bt_cap"], Bp0)
    Bp = _round_up(Bp0, BT)
    n_bt = Bp // BT

    # Time: pad to a multiple of the chunk size and mask the tail steps.
    TC = min(tune["tc_cap"], _round_up(T, 8))
    Tp = _round_up(T, TC)
    n_tc = Tp // TC

    # Host-side relayout of the (small) x tensor into per-batch-tile,
    # time-major rows: x_r[b, t*BT + j, :] = x[b*BT + j, t, :].
    xp = jnp.zeros((Bp, Tp, I), jnp.float32).at[:B, :T, :].set(
        x_btI.astype(jnp.float32))
    x_r = (xp.reshape(n_bt, BT, Tp, I)
             .transpose(0, 2, 1, 3)
             .reshape(n_bt, Tp * BT, I)
             .astype(jnp.bfloat16))

    kernel = functools.partial(_lstm_kernel, seq_len=T, mask_tail=(Tp != T))

    out_p = pl.pallas_call(
        kernel,
        out_shape=jax.ShapeDtypeStruct((Bp, Cp), jnp.float32),
        grid_spec=pltpu.PrefetchScalarGridSpec(
            num_scalar_prefetch=0,
            grid=(n_bt, n_tc),
            in_specs=[
                pl.BlockSpec((1, TC * BT, I), lambda b, t: (b, t, 0)),  # x chunk
                pl.BlockSpec((I, G), lambda b, t: (0, 0)),              # W_ih^T
                pl.BlockSpec((1, G), lambda b, t: (0, 0)),              # bias
                pl.BlockSpec((Hp, G), lambda b, t: (0, 0)),             # W_hh^T
                pl.BlockSpec((Hp, Cp), lambda b, t: (0, 0)),            # W_fc^T
                pl.BlockSpec((1, Cp), lambda b, t: (0, 0)),             # b_fc
            ],
            out_specs=pl.BlockSpec((BT, Cp), lambda b, t: (b, 0)),
            scratch_shapes=[
                pltpu.VMEM((TC * BT, G), jnp.float32),   # chunk gates (VMEM only)
                pltpu.VMEM((BT, Hp), jnp.float32),       # h
                pltpu.VMEM((BT, Hp), jnp.float32),       # c
            ],
        ),
        compiler_params=pltpu.CompilerParams(
            dimension_semantics=("parallel", "arbitrary"),
            vmem_limit_bytes=tune["vmem_limit"]),
    )(x_r, wih, bias, whh, wfc, bfc)

    return out_p[:B, :C]


# --------------------------------------------------------------------------
# Parameter init: PyTorch-style uniform(-1/sqrt(H), 1/sqrt(H)), then padded /
# transposed / bf16-cast into the kernel layout.  Gate order = [i, f, g, o],
# each gate in its own 128-aligned Hp slab.  Padded weight/bias entries are
# exactly zero so padded c/h lanes stay 0 (sigmoid(0)=0.5, tanh(0)=0).
# --------------------------------------------------------------------------
def init_params(key, input_size, hidden_size, num_classes):
    I, H, C = input_size, hidden_size, num_classes
    k = 1.0 / jnp.sqrt(jnp.float32(H))
    ks = jax.random.split(key, 6)
    w_ih = jax.random.uniform(ks[0], (4 * H, I), jnp.float32, -k, k)
    w_hh = jax.random.uniform(ks[1], (4 * H, H), jnp.float32, -k, k)
    b_ih = jax.random.uniform(ks[2], (4 * H,), jnp.float32, -k, k)
    b_hh = jax.random.uniform(ks[3], (4 * H,), jnp.float32, -k, k)
    w_fc = jax.random.uniform(ks[4], (C, H), jnp.float32, -k, k)
    b_fc = jax.random.uniform(ks[5], (C,), jnp.float32, -k, k)

    Hp = _round_up(H, 128)
    Cp = _round_up(C, 128)
    G = 4 * Hp

    wih_p = jnp.zeros((I, G), jnp.float32)
    whh_p = jnp.zeros((Hp, G), jnp.float32)
    bias_p = jnp.zeros((1, G), jnp.float32)
    for gi in range(4):
        wih_p = wih_p.at[:, gi * Hp:gi * Hp + H].set(w_ih[gi * H:(gi + 1) * H, :].T)
        whh_p = whh_p.at[:H, gi * Hp:gi * Hp + H].set(w_hh[gi * H:(gi + 1) * H, :].T)
        bias_p = bias_p.at[0, gi * Hp:gi * Hp + H].set(
            b_ih[gi * H:(gi + 1) * H] + b_hh[gi * H:(gi + 1) * H])

    wfc_p = jnp.zeros((Hp, Cp), jnp.float32).at[:H, :C].set(w_fc.T)
    bfc_p = jnp.zeros((1, Cp), jnp.float32).at[0, :C].set(b_fc)

    return dict(
        wih=wih_p.astype(jnp.bfloat16),   # (I, 4*Hp)
        whh=whh_p.astype(jnp.bfloat16),   # (Hp, 4*Hp)
        bias=bias_p,                      # (1, 4*Hp) f32
        wfc=wfc_p.astype(jnp.bfloat16),   # (Hp, Cp)
        bfc=bfc_p,                        # (1, Cp) f32
        hidden=H, hidden_pad=Hp, classes=C, classes_pad=Cp,
    )


# --------------------------------------------------------------------------
# Pure-JAX reference with the SAME numerics as the kernel (bf16 matmul
# operands, f32 accumulation & state) for a tight correctness check.
# --------------------------------------------------------------------------
def lstm_model_reference(x_btI, params):
    wih, whh, bias, wfc, bfc = (params["wih"], params["whh"], params["bias"],
                                params["wfc"], params["bfc"])
    Hp, C = params["hidden_pad"], params["classes"]
    B, T, I = x_btI.shape
    x16 = x_btI.astype(jnp.bfloat16)
    h = jnp.zeros((B, Hp), jnp.float32)
    c = jnp.zeros((B, Hp), jnp.float32)
    for t in range(T):
        g = (jnp.dot(x16[:, t, :], wih, preferred_element_type=jnp.float32)
             + bias
             + jnp.dot(h.astype(jnp.bfloat16), whh,
                       preferred_element_type=jnp.float32))
        i_g = _sigmoid_tanh(g[:, 0 * Hp:1 * Hp])
        f_g = _sigmoid_tanh(g[:, 1 * Hp:2 * Hp])
        g_g = jnp.tanh(g[:, 2 * Hp:3 * Hp])
        o_g = _sigmoid_tanh(g[:, 3 * Hp:4 * Hp])
        c = f_g * c + i_g * g_g
        h = o_g * jnp.tanh(c)
    out = jnp.dot(h.astype(jnp.bfloat16), wfc,
                  preferred_element_type=jnp.float32) + bfc
    return out[:, :C]


if __name__ == "__main__":
    B, T, I, H, C = 2, 8, 16, 32, 4   # batch, seq, input_size, hidden, classes

    key = jax.random.PRNGKey(0)
    k_x, k_p = jax.random.split(key)
    x = jax.random.normal(k_x, (B, T, I), jnp.float32)   # dense padded batch
    params = init_params(k_p, I, H, C)

    out = lstm_model_forward(x, params)
    out = jax.block_until_ready(out)

    ref = lstm_model_reference(x, params)
    assert out.shape == (B, C)
    assert jnp.allclose(out, ref, atol=1e-3, rtol=1e-3), \
        "kernel mismatch vs JAX reference"

    print("KERNEL_OK")
</pallas_src>

<mosaic_0001>
module attributes {stable_mosaic.version = 11 : i64} {
  func.func @_lstm_kernel(%arg0: i32, %arg1: i32, %arg2: memref<1x64x16xbf16, #tpu.memory_space<vmem>>, %arg3: memref<16x512xbf16, #tpu.memory_space<vmem>>, %arg4: memref<1x512xf32, #tpu.memory_space<vmem>>, %arg5: memref<128x512xbf16, #tpu.memory_space<vmem>>, %arg6: memref<128x128xbf16, #tpu.memory_space<vmem>>, %arg7: memref<1x128xf32, #tpu.memory_space<vmem>>, %arg8: memref<8x128xf32, #tpu.memory_space<vmem>>, %arg9: memref<64x512xf32, #tpu.memory_space<vmem>>, %arg10: memref<8x128xf32, #tpu.memory_space<vmem>>, %arg11: memref<8x128xf32, #tpu.memory_space<vmem>>) attributes {dimension_semantics = [#tpu.dimension_semantics<parallel>, #tpu.dimension_semantics<arbitrary>], iteration_bounds = array<i64: 1, 1>, scalar_prefetch = 0 : i64, scratch_operands = 3 : i64, tpu.core_type = #tpu.core_type<tc>, window_params = [{transform_indices = @transform_0, window_bounds = array<i64: 1, 64, 16>}, {pipeline_mode = #tpu.pipeline_mode<synchronous>, transform_indices = @transform_1, window_bounds = array<i64: 16, 512>}, {pipeline_mode = #tpu.pipeline_mode<synchronous>, transform_indices = @transform_2, window_bounds = array<i64: 1, 512>}, {pipeline_mode = #tpu.pipeline_mode<synchronous>, transform_indices = @transform_3, window_bounds = array<i64: 128, 512>}, {pipeline_mode = #tpu.pipeline_mode<synchronous>, transform_indices = @transform_4, window_bounds = array<i64: 128, 128>}, {pipeline_mode = #tpu.pipeline_mode<synchronous>, transform_indices = @transform_5, window_bounds = array<i64: 1, 128>}, {transform_indices = @transform_6, window_bounds = array<i64: 8, 128>}]} {
    %c0_i32 = arith.constant 0 : i32
    %0 = arith.cmpi eq, %arg1, %c0_i32 : i32
    %1 = arith.extui %0 : i1 to i32
    %c0_i32_0 = arith.constant 0 : i32
    %2 = arith.cmpi ne, %1, %c0_i32_0 : i32
    scf.if %2 {
      %cst_118 = arith.constant 0.000000e+00 : f32
      %323 = vector.broadcast %cst_118 : f32 to vector<8x128xf32>
      %c0_119 = arith.constant 0 : index
      %c0_120 = arith.constant 0 : index
      %324 = vector.load %arg10[%c0_119, %c0_120] : memref<8x128xf32, #tpu.memory_space<vmem>>, vector<8x128xf32>
      tpu.vector_store %arg10[%c0_119, %c0_120], %323 {strides = array<i32>} : memref<8x128xf32, #tpu.memory_space<vmem>>, vector<8x128xf32>,
      %cst_121 = arith.constant 0.000000e+00 : f32
      %325 = vector.broadcast %cst_121 : f32 to vector<8x128xf32>
      %c0_122 = arith.constant 0 : index
      %c0_123 = arith.constant 0 : index
      %326 = vector.load %arg11[%c0_122, %c0_123] : memref<8x128xf32, #tpu.memory_space<vmem>>, vector<8x128xf32>
      tpu.vector_store %arg11[%c0_122, %c0_123], %325 {strides = array<i32>} : memref<8x128xf32, #tpu.memory_space<vmem>>, vector<8x128xf32>,
    } else {
    }
    %c0 = arith.constant 0 : index
    %c0_1 = arith.constant 0 : index
    %c0_2 = arith.constant 0 : index
    %3 = vector.load %arg2[%c0, %c0_1, %c0_2] : memref<1x64x16xbf16, #tpu.memory_space<vmem>>, vector<1x64x16xbf16>
    %4 = vector.shape_cast %3 : vector<1x64x16xbf16> to vector<64x16xbf16>
    %c0_3 = arith.constant 0 : index
    %c0_4 = arith.constant 0 : index
    %5 = vector.load %arg3[%c0_3, %c0_4] : memref<16x512xbf16, #tpu.memory_space<vmem>>, vector<16x512xbf16>
    %cst = arith.constant dense<0.000000e+00> : vector<64x512xf32>
    %6 = tpu.matmul %4, %5, %cst {dimension_numbers = #tpu.dot_dimension_numbers<[1], [0], [0], [1], [0, 0, 1, 1], [], []>} : vector<64x16xbf16>, vector<16x512xbf16>, vector<64x512xf32> -> vector<64x512xf32>
    %c0_5 = arith.constant 0 : index
    %c0_6 = arith.constant 0 : index
    %7 = vector.load %arg4[%c0_5, %c0_6] : memref<1x512xf32, #tpu.memory_space<vmem>>, vector<1x512xf32>
    %8 = vector.broadcast %7 : vector<1x512xf32> to vector<64x512xf32>
    %9 = arith.addf %6, %8 : vector<64x512xf32>
    %c0_7 = arith.constant 0 : index
    %c0_8 = arith.constant 0 : index
    %10 = vector.load %arg9[%c0_7, %c0_8] : memref<64x512xf32, #tpu.memory_space<vmem>>, vector<64x512xf32>
    tpu.vector_store %arg9[%c0_7, %c0_8], %9 {strides = array<i32>} : memref<64x512xf32, #tpu.memory_space<vmem>>, vector<64x512xf32>,
    %c0_9 = arith.constant 0 : index
    %c0_10 = arith.constant 0 : index
    %11 = vector.load %arg5[%c0_9, %c0_10] : memref<128x512xbf16, #tpu.memory_space<vmem>>, vector<128x512xbf16>
    %c0_11 = arith.constant 0 : index
    %c0_12 = arith.constant 0 : index
    %12 = vector.load %arg10[%c0_11, %c0_12] : memref<8x128xf32, #tpu.memory_space<vmem>>, vector<8x128xf32>
    %c0_13 = arith.constant 0 : index
    %c0_14 = arith.constant 0 : index
    %13 = vector.load %arg11[%c0_13, %c0_14] : memref<8x128xf32, #tpu.memory_space<vmem>>, vector<8x128xf32>
    %c0_i32_15 = arith.constant 0 : i32
    %c8_i32 = arith.constant 8 : i32
    %14 = arith.muli %c0_i32_15, %c8_i32 : i32
    %15 = tpu.assume_multiple %14, 8 : i32
    %16 = arith.index_cast %15 : i32 to index
    %c0_16 = arith.constant 0 : index
    %17 = vector.load %arg9[%16, %c0_16] : memref<64x512xf32, #tpu.memory_space<vmem>>, vector<8x512xf32>
    %18 = arith.truncf %12 : vector<8x128xf32> to vector<8x128xbf16>
    %cst_17 = arith.constant dense<0.000000e+00> : vector<8x512xf32>
    %19 = tpu.matmul %18, %11, %cst_17 {dimension_numbers = #tpu.dot_dimension_numbers<[1], [0], [0], [1], [0, 0, 1, 1], [], []>} : vector<8x128xbf16>, vector<128x512xbf16>, vector<8x512xf32> -> vector<8x512xf32>
    %20 = arith.addf %17, %19 : vector<8x512xf32>
    %21 = vector.extract_strided_slice %20 {offsets = [0, 0], sizes = [8, 128], strides = [1, 1]} : vector<8x512xf32> to vector<8x128xf32>
    %cst_18 = arith.constant 5.000000e-01 : f32
    %22 = vector.broadcast %cst_18 : f32 to vector<8x128xf32>
    %23 = arith.mulf %22, %21 : vector<8x128xf32>
    %24 = math.tanh %23 : vector<8x128xf32>
    %cst_19 = arith.constant 5.000000e-01 : f32
    %25 = vector.broadcast %cst_19 : f32 to vector<8x128xf32>
    %26 = arith.mulf %25, %24 : vector<8x128xf32>
    %cst_20 = arith.constant 5.000000e-01 : f32
    %27 = vector.broadcast %cst_20 : f32 to vector<8x128xf32>
    %28 = arith.addf %26, %27 : vector<8x128xf32>
    %29 = vector.extract_strided_slice %20 {offsets = [0, 128], sizes = [8, 128], strides = [1, 1]} : vector<8x512xf32> to vector<8x128xf32>
    %cst_21 = arith.constant 5.000000e-01 : f32
    %30 = vector.broadcast %cst_21 : f32 to vector<8x128xf32>
    %31 = arith.mulf %30, %29 : vector<8x128xf32>
    %32 = math.tanh %31 : vector<8x128xf32>
    %cst_22 = arith.constant 5.000000e-01 : f32
    %33 = vector.broadcast %cst_22 : f32 to vector<8x128xf32>
    %34 = arith.mulf %33, %32 : vector<8x128xf32>
    %cst_23 = arith.constant 5.000000e-01 : f32
    %35 = vector.broadcast %cst_23 : f32 to vector<8x128xf32>
    %36 = arith.addf %34, %35 : vector<8x128xf32>
    %37 = vector.extract_strided_slice %20 {offsets = [0, 256], sizes = [8, 128], strides = [1, 1]} : vector<8x512xf32> to vector<8x128xf32>
    %38 = math.tanh %37 : vector<8x128xf32>
    %39 = vector.extract_strided_slice %20 {offsets = [0, 384], sizes = [8, 128], strides = [1, 1]} : vector<8x512xf32> to vector<8x128xf32>
    %cst_24 = arith.constant 5.000000e-01 : f32
    %40 = vector.broadcast %cst_24 : f32 to vector<8x128xf32>
    %41 = arith.mulf %40, %39 : vector<8x128xf32>
    %42 = math.tanh %41 : vector<8x128xf32>
    %cst_25 = arith.constant 5.000000e-01 : f32
    %43 = vector.broadcast %cst_25 : f32 to vector<8x128xf32>
    %44 = arith.mulf %43, %42 : vector<8x128xf32>
    %cst_26 = arith.constant 5.000000e-01 : f32
    %45 = vector.broadcast %cst_26 : f32 to vector<8x128xf32>
    %46 = arith.addf %44, %45 : vector<8x128xf32>
    %47 = arith.mulf %36, %13 : vector<8x128xf32>
    %48 = arith.mulf %28, %38 : vector<8x128xf32>
    %49 = arith.addf %47, %48 : vector<8x128xf32>
    %50 = math.tanh %49 : vector<8x128xf32>
    %51 = arith.mulf %46, %50 : vector<8x128xf32>
    %c1_i32 = arith.constant 1 : i32
    %c8_i32_27 = arith.constant 8 : i32
    %52 = arith.muli %c1_i32, %c8_i32_27 : i32
    %53 = tpu.assume_multiple %52, 8 : i32
    %54 = arith.index_cast %53 : i32 to index
    %c0_28 = arith.constant 0 : index
    %55 = vector.load %arg9[%54, %c0_28] : memref<64x512xf32, #tpu.memory_space<vmem>>, vector<8x512xf32>
    %56 = arith.truncf %51 : vector<8x128xf32> to vector<8x128xbf16>
    %cst_29 = arith.constant dense<0.000000e+00> : vector<8x512xf32>
    %57 = tpu.matmul %56, %11, %cst_29 {dimension_numbers = #tpu.dot_dimension_numbers<[1], [0], [0], [1], [0, 0, 1, 1], [], []>} : vector<8x128xbf16>, vector<128x512xbf16>, vector<8x512xf32> -> vector<8x512xf32>
    %58 = arith.addf %55, %57 : vector<8x512xf32>
    %59 = vector.extract_strided_slice %58 {offsets = [0, 0], sizes = [8, 128], strides = [1, 1]} : vector<8x512xf32> to vector<8x128xf32>
    %cst_30 = arith.constant 5.000000e-01 : f32
    %60 = vector.broadcast %cst_30 : f32 to vector<8x128xf32>
    %61 = arith.mulf %60, %59 : vector<8x128xf32>
    %62 = math.tanh %61 : vector<8x128xf32>
    %cst_31 = arith.constant 5.000000e-01 : f32
    %63 = vector.broadcast %cst_31 : f32 to vector<8x128xf32>
    %64 = arith.mulf %63, %62 : vector<8x128xf32>
    %cst_32 = arith.constant 5.000000e-01 : f32
    %65 = vector.broadcast %cst_32 : f32 to vector<8x128xf32>
    %66 = arith.addf %64, %65 : vector<8x128xf32>
    %67 = vector.extract_strided_slice %58 {offsets = [0, 128], sizes = [8, 128], strides = [1, 1]} : vector<8x512xf32> to vector<8x128xf32>
    %cst_33 = arith.constant 5.000000e-01 : f32
    %68 = vector.broadcast %cst_33 : f32 to vector<8x128xf32>
    %69 = arith.mulf %68, %67 : vector<8x128xf32>
    %70 = math.tanh %69 : vector<8x128xf32>
    %cst_34 = arith.constant 5.000000e-01 : f32
    %71 = vector.broadcast %cst_34 : f32 to vector<8x128xf32>
    %72 = arith.mulf %71, %70 : vector<8x128xf32>
    %cst_35 = arith.constant 5.000000e-01 : f32
    %73 = vector.broadcast %cst_35 : f32 to vector<8x128xf32>
    %74 = arith.addf %72, %73 : vector<8x128xf32>
    %75 = vector.extract_strided_slice %58 {offsets = [0, 256], sizes = [8, 128], strides = [1, 1]} : vector<8x512xf32> to vector<8x128xf32>
    %76 = math.tanh %75 : vector<8x128xf32>
    %77 = vector.extract_strided_slice %58 {offsets = [0, 384], sizes = [8, 128], strides = [1, 1]} : vector<8x512xf32> to vector<8x128xf32>
    %cst_36 = arith.constant 5.000000e-01 : f32
    %78 = vector.broadcast %cst_36 : f32 to vector<8x128xf32>
    %79 = arith.mulf %78, %77 : vector<8x128xf32>
    %80 = math.tanh %79 : vector<8x128xf32>
    %cst_37 = arith.constant 5.000000e-01 : f32
    %81 = vector.broadcast %cst_37 : f32 to vector<8x128xf32>
    %82 = arith.mulf %81, %80 : vector<8x128xf32>
    %cst_38 = arith.constant 5.000000e-01 : f32
    %83 = vector.broadcast %cst_38 : f32 to vector<8x128xf32>
    %84 = arith.addf %82, %83 : vector<8x128xf32>
    %85 = arith.mulf %74, %49 : vector<8x128xf32>
    %86 = arith.mulf %66, %76 : vector<8x128xf32>
    %87 = arith.addf %85, %86 : vector<8x128xf32>
    %88 = math.tanh %87 : vector<8x128xf32>
    %89 = arith.mulf %84, %88 : vector<8x128xf32>
    %c2_i32 = arith.constant 2 : i32
    %c8_i32_39 = arith.constant 8 : i32
    %90 = arith.muli %c2_i32, %c8_i32_39 : i32
    %91 = tpu.assume_multiple %90, 8 : i32
    %92 = arith.index_cast %91 : i32 to index
    %c0_40 = arith.constant 0 : index
    %93 = vector.load %arg9[%92, %c0_40] : memref<64x512xf32, #tpu.memory_space<vmem>>, vector<8x512xf32>
    %94 = arith.truncf %89 : vector<8x128xf32> to vector<8x128xbf16>
    %cst_41 = arith.constant dense<0.000000e+00> : vector<8x512xf32>
    %95 = tpu.matmul %94, %11, %cst_41 {dimension_numbers = #tpu.dot_dimension_numbers<[1], [0], [0], [1], [0, 0, 1, 1], [], []>} : vector<8x128xbf16>, vector<128x512xbf16>, vector<8x512xf32> -> vector<8x512xf32>
    %96 = arith.addf %93, %95 : vector<8x512xf32>
    %97 = vector.extract_strided_slice %96 {offsets = [0, 0], sizes = [8, 128], strides = [1, 1]} : vector<8x512xf32> to vector<8x128xf32>
    %cst_42 = arith.constant 5.000000e-01 : f32
    %98 = vector.broadcast %cst_42 : f32 to vector<8x128xf32>
    %99 = arith.mulf %98, %97 : vector<8x128xf32>
    %100 = math.tanh %99 : vector<8x128xf32>
    %cst_43 = arith.constant 5.000000e-01 : f32
    %101 = vector.broadcast %cst_43 : f32 to vector<8x128xf32>
    %102 = arith.mulf %101, %100 : vector<8x128xf32>
    %cst_44 = arith.constant 5.000000e-01 : f32
    %103 = vector.broadcast %cst_44 : f32 to vector<8x128xf32>
    %104 = arith.addf %102, %103 : vector<8x128xf32>
    %105 = vector.extract_strided_slice %96 {offsets = [0, 128], sizes = [8, 128], strides = [1, 1]} : vector<8x512xf32> to vector<8x128xf32>
    %cst_45 = arith.constant 5.000000e-01 : f32
    %106 = vector.broadcast %cst_45 : f32 to vector<8x128xf32>
    %107 = arith.mulf %106, %105 : vector<8x128xf32>
    %108 = math.tanh %107 : vector<8x128xf32>
    %cst_46 = arith.constant 5.000000e-01 : f32
    %109 = vector.broadcast %cst_46 : f32 to vector<8x128xf32>
    %110 = arith.mulf %109, %108 : vector<8x128xf32>
    %cst_47 = arith.constant 5.000000e-01 : f32
    %111 = vector.broadcast %cst_47 : f32 to vector<8x128xf32>
    %112 = arith.addf %110, %111 : vector<8x128xf32>
    %113 = vector.extract_strided_slice %96 {offsets = [0, 256], sizes = [8, 128], strides = [1, 1]} : vector<8x512xf32> to vector<8x128xf32>
    %114 = math.tanh %113 : vector<8x128xf32>
    %115 = vector.extract_strided_slice %96 {offsets = [0, 384], sizes = [8, 128], strides = [1, 1]} : vector<8x512xf32> to vector<8x128xf32>
    %cst_48 = arith.constant 5.000000e-01 : f32
    %116 = vector.broadcast %cst_48 : f32 to vector<8x128xf32>
    %117 = arith.mulf %116, %115 : vector<8x128xf32>
    %118 = math.tanh %117 : vector<8x128xf32>
    %cst_49 = arith.constant 5.000000e-01 : f32
    %119 = vector.broadcast %cst_49 : f32 to vector<8x128xf32>
    %120 = arith.mulf %119, %118 : vector<8x128xf32>
    %cst_50 = arith.constant 5.000000e-01 : f32
    %121 = vector.broadcast %cst_50 : f32 to vector<8x128xf32>
    %122 = arith.addf %120, %121 : vector<8x128xf32>
    %123 = arith.mulf %112, %87 : vector<8x128xf32>
    %124 = arith.mulf %104, %114 : vector<8x128xf32>
    %125 = arith.addf %123, %124 : vector<8x128xf32>
    %126 = math.tanh %125 : vector<8x128xf32>
    %127 = arith.mulf %122, %126 : vector<8x128xf32>
    %c3_i32 = arith.constant 3 : i32
    %c8_i32_51 = arith.constant 8 : i32
    %128 = arith.muli %c3_i32, %c8_i32_51 : i32
    %129 = tpu.assume_multiple %128, 8 : i32
    %130 = arith.index_cast %129 : i32 to index
    %c0_52 = arith.constant 0 : index
    %131 = vector.load %arg9[%130, %c0_52] : memref<64x512xf32, #tpu.memory_space<vmem>>, vector<8x512xf32>
    %132 = arith.truncf %127 : vector<8x128xf32> to vector<8x128xbf16>
    %cst_53 = arith.constant dense<0.000000e+00> : vector<8x512xf32>
    %133 = tpu.matmul %132, %11, %cst_53 {dimension_numbers = #tpu.dot_dimension_numbers<[1], [0], [0], [1], [0, 0, 1, 1], [], []>} : vector<8x128xbf16>, vector<128x512xbf16>, vector<8x512xf32> -> vector<8x512xf32>
    %134 = arith.addf %131, %133 : vector<8x512xf32>
    %135 = vector.extract_strided_slice %134 {offsets = [0, 0], sizes = [8, 128], strides = [1, 1]} : vector<8x512xf32> to vector<8x128xf32>
    %cst_54 = arith.constant 5.000000e-01 : f32
    %136 = vector.broadcast %cst_54 : f32 to vector<8x128xf32>
    %137 = arith.mulf %136, %135 : vector<8x128xf32>
    %138 = math.tanh %137 : vector<8x128xf32>
    %cst_55 = arith.constant 5.000000e-01 : f32
    %139 = vector.broadcast %cst_55 : f32 to vector<8x128xf32>
    %140 = arith.mulf %139, %138 : vector<8x128xf32>
    %cst_56 = arith.constant 5.000000e-01 : f32
    %141 = vector.broadcast %cst_56 : f32 to vector<8x128xf32>
    %142 = arith.addf %140, %141 : vector<8x128xf32>
    %143 = vector.extract_strided_slice %134 {offsets = [0, 128], sizes = [8, 128], strides = [1, 1]} : vector<8x512xf32> to vector<8x128xf32>
    %cst_57 = arith.constant 5.000000e-01 : f32
    %144 = vector.broadcast %cst_57 : f32 to vector<8x128xf32>
    %145 = arith.mulf %144, %143 : vector<8x128xf32>
    %146 = math.tanh %145 : vector<8x128xf32>
    %cst_58 = arith.constant 5.000000e-01 : f32
    %147 = vector.broadcast %cst_58 : f32 to vector<8x128xf32>
    %148 = arith.mulf %147, %146 : vector<8x128xf32>
    %cst_59 = arith.constant 5.000000e-01 : f32
    %149 = vector.broadcast %cst_59 : f32 to vector<8x128xf32>
    %150 = arith.addf %148, %149 : vector<8x128xf32>
    %151 = vector.extract_strided_slice %134 {offsets = [0, 256], sizes = [8, 128], strides = [1, 1]} : vector<8x512xf32> to vector<8x128xf32>
    %152 = math.tanh %151 : vector<8x128xf32>
    %153 = vector.extract_strided_slice %134 {offsets = [0, 384], sizes = [8, 128], strides = [1, 1]} : vector<8x512xf32> to vector<8x128xf32>
    %cst_60 = arith.constant 5.000000e-01 : f32
    %154 = vector.broadcast %cst_60 : f32 to vector<8x128xf32>
    %155 = arith.mulf %154, %153 : vector<8x128xf32>
    %156 = math.tanh %155 : vector<8x128xf32>
    %cst_61 = arith.constant 5.000000e-01 : f32
    %157 = vector.broadcast %cst_61 : f32 to vector<8x128xf32>
    %158 = arith.mulf %157, %156 : vector<8x128xf32>
    %cst_62 = arith.constant 5.000000e-01 : f32
    %159 = vector.broadcast %cst_62 : f32 to vector<8x128xf32>
    %160 = arith.addf %158, %159 : vector<8x128xf32>
    %161 = arith.mulf %150, %125 : vector<8x128xf32>
    %162 = arith.mulf %142, %152 : vector<8x128xf32>
    %163 = arith.addf %161, %162 : vector<8x128xf32>
    %164 = math.tanh %163 : vector<8x128xf32>
    %165 = arith.mulf %160, %164 : vector<8x128xf32>
    %c4_i32 = arith.constant 4 : i32
    %c8_i32_63 = arith.constant 8 : i32
    %166 = arith.muli %c4_i32, %c8_i32_63 : i32
    %167 = tpu.assume_multiple %166, 8 : i32
    %168 = arith.index_cast %167 : i32 to index
    %c0_64 = arith.constant 0 : index
    %169 = vector.load %arg9[%168, %c0_64] : memref<64x512xf32, #tpu.memory_space<vmem>>, vector<8x512xf32>
    %170 = arith.truncf %165 : vector<8x128xf32> to vector<8x128xbf16>
    %cst_65 = arith.constant dense<0.000000e+00> : vector<8x512xf32>
    %171 = tpu.matmul %170, %11, %cst_65 {dimension_numbers = #tpu.dot_dimension_numbers<[1], [0], [0], [1], [0, 0, 1, 1], [], []>} : vector<8x128xbf16>, vector<128x512xbf16>, vector<8x512xf32> -> vector<8x512xf32>
    %172 = arith.addf %169, %171 : vector<8x512xf32>
    %173 = vector.extract_strided_slice %172 {offsets = [0, 0], sizes = [8, 128], strides = [1, 1]} : vector<8x512xf32> to vector<8x128xf32>
    %cst_66 = arith.constant 5.000000e-01 : f32
    %174 = vector.broadcast %cst_66 : f32 to vector<8x128xf32>
    %175 = arith.mulf %174, %173 : vector<8x128xf32>
    %176 = math.tanh %175 : vector<8x128xf32>
    %cst_67 = arith.constant 5.000000e-01 : f32
    %177 = vector.broadcast %cst_67 : f32 to vector<8x128xf32>
    %178 = arith.mulf %177, %176 : vector<8x128xf32>
    %cst_68 = arith.constant 5.000000e-01 : f32
    %179 = vector.broadcast %cst_68 : f32 to vector<8x128xf32>
    %180 = arith.addf %178, %179 : vector<8x128xf32>
    %181 = vector.extract_strided_slice %172 {offsets = [0, 128], sizes = [8, 128], strides = [1, 1]} : vector<8x512xf32> to vector<8x128xf32>
    %cst_69 = arith.constant 5.000000e-01 : f32
    %182 = vector.broadcast %cst_69 : f32 to vector<8x128xf32>
    %183 = arith.mulf %182, %181 : vector<8x128xf32>
    %184 = math.tanh %183 : vector<8x128xf32>
    %cst_70 = arith.constant 5.000000e-01 : f32
    %185 = vector.broadcast %cst_70 : f32 to vector<8x128xf32>
    %186 = arith.mulf %185, %184 : vector<8x128xf32>
    %cst_71 = arith.constant 5.000000e-01 : f32
    %187 = vector.broadcast %cst_71 : f32 to vector<8x128xf32>
    %188 = arith.addf %186, %187 : vector<8x128xf32>
    %189 = vector.extract_strided_slice %172 {offsets = [0, 256], sizes = [8, 128], strides = [1, 1]} : vector<8x512xf32> to vector<8x128xf32>
    %190 = math.tanh %189 : vector<8x128xf32>
    %191 = vector.extract_strided_slice %172 {offsets = [0, 384], sizes = [8, 128], strides = [1, 1]} : vector<8x512xf32> to vector<8x128xf32>
    %cst_72 = arith.constant 5.000000e-01 : f32
    %192 = vector.broadcast %cst_72 : f32 to vector<8x128xf32>
    %193 = arith.mulf %192, %191 : vector<8x128xf32>
    %194 = math.tanh %193 : vector<8x128xf32>
    %cst_73 = arith.constant 5.000000e-01 : f32
    %195 = vector.broadcast %cst_73 : f32 to vector<8x128xf32>
    %196 = arith.mulf %195, %194 : vector<8x128xf32>
    %cst_74 = arith.constant 5.000000e-01 : f32
    %197 = vector.broadcast %cst_74 : f32 to vector<8x128xf32>
    %198 = arith.addf %196, %197 : vector<8x128xf32>
    %199 = arith.mulf %188, %163 : vector<8x128xf32>
    %200 = arith.mulf %180, %190 : vector<8x128xf32>
    %201 = arith.addf %199, %200 : vector<8x128xf32>
    %202 = math.tanh %201 : vector<8x128xf32>
    %203 = arith.mulf %198, %202 : vector<8x128xf32>
    %c5_i32 = arith.constant 5 : i32
    %c8_i32_75 = arith.constant 8 : i32
    %204 = arith.muli %c5_i32, %c8_i32_75 : i32
    %205 = tpu.assume_multiple %204, 8 : i32
    %206 = arith.index_cast %205 : i32 to index
    %c0_76 = arith.constant 0 : index
    %207 = vector.load %arg9[%206, %c0_76] : memref<64x512xf32, #tpu.memory_space<vmem>>, vector<8x512xf32>
    %208 = arith.truncf %203 : vector<8x128xf32> to vector<8x128xbf16>
    %cst_77 = arith.constant dense<0.000000e+00> : vector<8x512xf32>
    %209 = tpu.matmul %208, %11, %cst_77 {dimension_numbers = #tpu.dot_dimension_numbers<[1], [0], [0], [1], [0, 0, 1, 1], [], []>} : vector<8x128xbf16>, vector<128x512xbf16>, vector<8x512xf32> -> vector<8x512xf32>
    %210 = arith.addf %207, %209 : vector<8x512xf32>
    %211 = vector.extract_strided_slice %210 {offsets = [0, 0], sizes = [8, 128], strides = [1, 1]} : vector<8x512xf32> to vector<8x128xf32>
    %cst_78 = arith.constant 5.000000e-01 : f32
    %212 = vector.broadcast %cst_78 : f32 to vector<8x128xf32>
    %213 = arith.mulf %212, %211 : vector<8x128xf32>
    %214 = math.tanh %213 : vector<8x128xf32>
    %cst_79 = arith.constant 5.000000e-01 : f32
    %215 = vector.broadcast %cst_79 : f32 to vector<8x128xf32>
    %216 = arith.mulf %215, %214 : vector<8x128xf32>
    %cst_80 = arith.constant 5.000000e-01 : f32
    %217 = vector.broadcast %cst_80 : f32 to vector<8x128xf32>
    %218 = arith.addf %216, %217 : vector<8x128xf32>
    %219 = vector.extract_strided_slice %210 {offsets = [0, 128], sizes = [8, 128], strides = [1, 1]} : vector<8x512xf32> to vector<8x128xf32>
    %cst_81 = arith.constant 5.000000e-01 : f32
    %220 = vector.broadcast %cst_81 : f32 to vector<8x128xf32>
    %221 = arith.mulf %220, %219 : vector<8x128xf32>
    %222 = math.tanh %221 : vector<8x128xf32>
    %cst_82 = arith.constant 5.000000e-01 : f32
    %223 = vector.broadcast %cst_82 : f32 to vector<8x128xf32>
    %224 = arith.mulf %223, %222 : vector<8x128xf32>
    %cst_83 = arith.constant 5.000000e-01 : f32
    %225 = vector.broadcast %cst_83 : f32 to vector<8x128xf32>
    %226 = arith.addf %224, %225 : vector<8x128xf32>
    %227 = vector.extract_strided_slice %210 {offsets = [0, 256], sizes = [8, 128], strides = [1, 1]} : vector<8x512xf32> to vector<8x128xf32>
    %228 = math.tanh %227 : vector<8x128xf32>
    %229 = vector.extract_strided_slice %210 {offsets = [0, 384], sizes = [8, 128], strides = [1, 1]} : vector<8x512xf32> to vector<8x128xf32>
    %cst_84 = arith.constant 5.000000e-01 : f32
    %230 = vector.broadcast %cst_84 : f32 to vector<8x128xf32>
    %231 = arith.mulf %230, %229 : vector<8x128xf32>
    %232 = math.tanh %231 : vector<8x128xf32>
    %cst_85 = arith.constant 5.000000e-01 : f32
    %233 = vector.broadcast %cst_85 : f32 to vector<8x128xf32>
    %234 = arith.mulf %233, %232 : vector<8x128xf32>
    %cst_86 = arith.constant 5.000000e-01 : f32
    %235 = vector.broadcast %cst_86 : f32 to vector<8x128xf32>
    %236 = arith.addf %234, %235 : vector<8x128xf32>
    %237 = arith.mulf %226, %201 : vector<8x128xf32>
    %238 = arith.mulf %218, %228 : vector<8x128xf32>
    %239 = arith.addf %237, %238 : vector<8x128xf32>
    %240 = math.tanh %239 : vector<8x128xf32>
    %241 = arith.mulf %236, %240 : vector<8x128xf32>
    %c6_i32 = arith.constant 6 : i32
    %c8_i32_87 = arith.constant 8 : i32
    %242 = arith.muli %c6_i32, %c8_i32_87 : i32
    %243 = tpu.assume_multiple %242, 8 : i32
    %244 = arith.index_cast %243 : i32 to index
    %c0_88 = arith.constant 0 : index
    %245 = vector.load %arg9[%244, %c0_88] : memref<64x512xf32, #tpu.memory_space<vmem>>, vector<8x512xf32>
    %246 = arith.truncf %241 : vector<8x128xf32> to vector<8x128xbf16>
    %cst_89 = arith.constant dense<0.000000e+00> : vector<8x512xf32>
    %247 = tpu.matmul %246, %11, %cst_89 {dimension_numbers = #tpu.dot_dimension_numbers<[1], [0], [0], [1], [0, 0, 1, 1], [], []>} : vector<8x128xbf16>, vector<128x512xbf16>, vector<8x512xf32> -> vector<8x512xf32>
    %248 = arith.addf %245, %247 : vector<8x512xf32>
    %249 = vector.extract_strided_slice %248 {offsets = [0, 0], sizes = [8, 128], strides = [1, 1]} : vector<8x512xf32> to vector<8x128xf32>
    %cst_90 = arith.constant 5.000000e-01 : f32
    %250 = vector.broadcast %cst_90 : f32 to vector<8x128xf32>
    %251 = arith.mulf %250, %249 : vector<8x128xf32>
    %252 = math.tanh %251 : vector<8x128xf32>
    %cst_91 = arith.constant 5.000000e-01 : f32
    %253 = vector.broadcast %cst_91 : f32 to vector<8x128xf32>
    %254 = arith.mulf %253, %252 : vector<8x128xf32>
    %cst_92 = arith.constant 5.000000e-01 : f32
    %255 = vector.broadcast %cst_92 : f32 to vector<8x128xf32>
    %256 = arith.addf %254, %255 : vector<8x128xf32>
    %257 = vector.extract_strided_slice %248 {offsets = [0, 128], sizes = [8, 128], strides = [1, 1]} : vector<8x512xf32> to vector<8x128xf32>
    %cst_93 = arith.constant 5.000000e-01 : f32
    %258 = vector.broadcast %cst_93 : f32 to vector<8x128xf32>
    %259 = arith.mulf %258, %257 : vector<8x128xf32>
    %260 = math.tanh %259 : vector<8x128xf32>
    %cst_94 = arith.constant 5.000000e-01 : f32
    %261 = vector.broadcast %cst_94 : f32 to vector<8x128xf32>
    %262 = arith.mulf %261, %260 : vector<8x128xf32>
    %cst_95 = arith.constant 5.000000e-01 : f32
    %263 = vector.broadcast %cst_95 : f32 to vector<8x128xf32>
    %264 = arith.addf %262, %263 : vector<8x128xf32>
    %265 = vector.extract_strided_slice %248 {offsets = [0, 256], sizes = [8, 128], strides = [1, 1]} : vector<8x512xf32> to vector<8x128xf32>
    %266 = math.tanh %265 : vector<8x128xf32>
    %267 = vector.extract_strided_slice %248 {offsets = [0, 384], sizes = [8, 128], strides = [1, 1]} : vector<8x512xf32> to vector<8x128xf32>
    %cst_96 = arith.constant 5.000000e-01 : f32
    %268 = vector.broadcast %cst_96 : f32 to vector<8x128xf32>
    %269 = arith.mulf %268, %267 : vector<8x128xf32>
    %270 = math.tanh %269 : vector<8x128xf32>
    %cst_97 = arith.constant 5.000000e-01 : f32
    %271 = vector.broadcast %cst_97 : f32 to vector<8x128xf32>
    %272 = arith.mulf %271, %270 : vector<8x128xf32>
    %cst_98 = arith.constant 5.000000e-01 : f32
    %273 = vector.broadcast %cst_98 : f32 to vector<8x128xf32>
    %274 = arith.addf %272, %273 : vector<8x128xf32>
    %275 = arith.mulf %264, %239 : vector<8x128xf32>
    %276 = arith.mulf %256, %266 : vector<8x128xf32>
    %277 = arith.addf %275, %276 : vector<8x128xf32>
    %278 = math.tanh %277 : vector<8x128xf32>
    %279 = arith.mulf %274, %278 : vector<8x128xf32>
    %c7_i32 = arith.constant 7 : i32
    %c8_i32_99 = arith.constant 8 : i32
    %280 = arith.muli %c7_i32, %c8_i32_99 : i32
    %281 = tpu.assume_multiple %280, 8 : i32
    %282 = arith.index_cast %281 : i32 to index
    %c0_100 = arith.constant 0 : index
    %283 = vector.load %arg9[%282, %c0_100] : memref<64x512xf32, #tpu.memory_space<vmem>>, vector<8x512xf32>
    %284 = arith.truncf %279 : vector<8x128xf32> to vector<8x128xbf16>
    %cst_101 = arith.constant dense<0.000000e+00> : vector<8x512xf32>
    %285 = tpu.matmul %284, %11, %cst_101 {dimension_numbers = #tpu.dot_dimension_numbers<[1], [0], [0], [1], [0, 0, 1, 1], [], []>} : vector<8x128xbf16>, vector<128x512xbf16>, vector<8x512xf32> -> vector<8x512xf32>
    %286 = arith.addf %283, %285 : vector<8x512xf32>
    %287 = vector.extract_strided_slice %286 {offsets = [0, 0], sizes = [8, 128], strides = [1, 1]} : vector<8x512xf32> to vector<8x128xf32>
    %cst_102 = arith.constant 5.000000e-01 : f32
    %288 = vector.broadcast %cst_102 : f32 to vector<8x128xf32>
    %289 = arith.mulf %288, %287 : vector<8x128xf32>
    %290 = math.tanh %289 : vector<8x128xf32>
    %cst_103 = arith.constant 5.000000e-01 : f32
    %291 = vector.broadcast %cst_103 : f32 to vector<8x128xf32>
    %292 = arith.mulf %291, %290 : vector<8x128xf32>
    %cst_104 = arith.constant 5.000000e-01 : f32
    %293 = vector.broadcast %cst_104 : f32 to vector<8x128xf32>
    %294 = arith.addf %292, %293 : vector<8x128xf32>
    %295 = vector.extract_strided_slice %286 {offsets = [0, 128], sizes = [8, 128], strides = [1, 1]} : vector<8x512xf32> to vector<8x128xf32>
    %cst_105 = arith.constant 5.000000e-01 : f32
    %296 = vector.broadcast %cst_105 : f32 to vector<8x128xf32>
    %297 = arith.mulf %296, %295 : vector<8x128xf32>
    %298 = math.tanh %297 : vector<8x128xf32>
    %cst_106 = arith.constant 5.000000e-01 : f32
    %299 = vector.broadcast %cst_106 : f32 to vector<8x128xf32>
    %300 = arith.mulf %299, %298 : vector<8x128xf32>
    %cst_107 = arith.constant 5.000000e-01 : f32
    %301 = vector.broadcast %cst_107 : f32 to vector<8x128xf32>
    %302 = arith.addf %300, %301 : vector<8x128xf32>
    %303 = vector.extract_strided_slice %286 {offsets = [0, 256], sizes = [8, 128], strides = [1, 1]} : vector<8x512xf32> to vector<8x128xf32>
    %304 = math.tanh %303 : vector<8x128xf32>
    %305 = vector.extract_strided_slice %286 {offsets = [0, 384], sizes = [8, 128], strides = [1, 1]} : vector<8x512xf32> to vector<8x128xf32>
    %cst_108 = arith.constant 5.000000e-01 : f32
    %306 = vector.broadcast %cst_108 : f32 to vector<8x128xf32>
    %307 = arith.mulf %306, %305 : vector<8x128xf32>
    %308 = math.tanh %307 : vector<8x128xf32>
    %cst_109 = arith.constant 5.000000e-01 : f32
    %309 = vector.broadcast %cst_109 : f32 to vector<8x128xf32>
    %310 = arith.mulf %309, %308 : vector<8x128xf32>
    %cst_110 = arith.constant 5.000000e-01 : f32
    %311 = vector.broadcast %cst_110 : f32 to vector<8x128xf32>
    %312 = arith.addf %310, %311 : vector<8x128xf32>
    %313 = arith.mulf %302, %277 : vector<8x128xf32>
    %314 = arith.mulf %294, %304 : vector<8x128xf32>
    %315 = arith.addf %313, %314 : vector<8x128xf32>
    %316 = math.tanh %315 : vector<8x128xf32>
    %317 = arith.mulf %312, %316 : vector<8x128xf32>
    %c8_i32_111 = arith.constant 8 : i32
    %c0_112 = arith.constant 0 : index
    %c0_113 = arith.constant 0 : index
    %318 = vector.load %arg10[%c0_112, %c0_113] : memref<8x128xf32, #tpu.memory_space<vmem>>, vector<8x128xf32>
    tpu.vector_store %arg10[%c0_112, %c0_113], %317 {strides = array<i32>} : memref<8x128xf32, #tpu.memory_space<vmem>>, vector<8x128xf32>,
    %c0_114 = arith.constant 0 : index
    %c0_115 = arith.constant 0 : index
    %319 = vector.load %arg11[%c0_114, %c0_115] : memref<8x128xf32, #tpu.memory_space<vmem>>, vector<8x128xf32>
    tpu.vector_store %arg11[%c0_114, %c0_115], %315 {strides = array<i32>} : memref<8x128xf32, #tpu.memory_space<vmem>>, vector<8x128xf32>,
    %c0_i32_116 = arith.constant 0 : i32
    %320 = arith.cmpi eq, %arg1, %c0_i32_116 : i32
    %321 = arith.extui %320 : i1 to i32
    %c0_i32_117 = arith.constant 0 : i32
    %322 = arith.cmpi ne, %321, %c0_i32_117 : i32
    scf.if %322 {
      %323 = arith.truncf %317 : vector<8x128xf32> to vector<8x128xbf16>
      %c0_118 = arith.constant 0 : index
      %c0_119 = arith.constant 0 : index
      %324 = vector.load %arg6[%c0_118, %c0_119] : memref<128x128xbf16, #tpu.memory_space<vmem>>, vector<128x128xbf16>
      %cst_120 = arith.constant dense<0.000000e+00> : vector<8x128xf32>
      %325 = tpu.matmul %323, %324, %cst_120 {dimension_numbers = #tpu.dot_dimension_numbers<[1], [0], [0], [1], [0, 0, 1, 1], [], []>} : vector<8x128xbf16>, vector<128x128xbf16>, vector<8x128xf32> -> vector<8x128xf32>
      %c0_121 = arith.constant 0 : index
      %c0_122 = arith.constant 0 : index
      %326 = vector.load %arg7[%c0_121, %c0_122] : memref<1x128xf32, #tpu.memory_space<vmem>>, vector<1x128xf32>
      %327 = vector.broadcast %326 : vector<1x128xf32> to vector<8x128xf32>
      %328 = arith.addf %325, %327 : vector<8x128xf32>
      %c0_123 = arith.constant 0 : index
      %c0_124 = arith.constant 0 : index
      %329 = vector.load %arg8[%c0_123, %c0_124] : memref<8x128xf32, #tpu.memory_space<vmem>>, vector<8x128xf32>
      tpu.vector_store %arg8[%c0_123, %c0_124], %328 {strides = array<i32>} : memref<8x128xf32, #tpu.memory_space<vmem>>, vector<8x128xf32>,
    } else {
    }
    return
  }
  func.func @transform_0(%arg0: i32, %arg1: i32) -> (i32, i32, i32) {
    %c0_i32 = arith.constant 0 : i32
    %c0_i32_0 = arith.constant 0 : i32
    return %arg0, %arg1, %c0_i32 : i32, i32, i32
  }
  func.func @transform_1(%arg0: i32, %arg1: i32) -> (i32, i32) {
    %c0_i32 = arith.constant 0 : i32
    %c0_i32_0 = arith.constant 0 : i32
    %c0_i32_1 = arith.constant 0 : i32
    return %c0_i32, %c0_i32_0 : i32, i32
  }
  func.func @transform_2(%arg0: i32, %arg1: i32) -> (i32, i32) {
    %c0_i32 = arith.constant 0 : i32
    %c0_i32_0 = arith.constant 0 : i32
    %c0_i32_1 = arith.constant 0 : i32
    return %c0_i32, %c0_i32_0 : i32, i32
  }
  func.func @transform_3(%arg0: i32, %arg1: i32) -> (i32, i32) {
    %c0_i32 = arith.constant 0 : i32
    %c0_i32_0 = arith.constant 0 : i32
    %c0_i32_1 = arith.constant 0 : i32
    return %c0_i32, %c0_i32_0 : i32, i32
  }
  func.func @transform_4(%arg0: i32, %arg1: i32) -> (i32, i32) {
    %c0_i32 = arith.constant 0 : i32
    %c0_i32_0 = arith.constant 0 : i32
    %c0_i32_1 = arith.constant 0 : i32
    return %c0_i32, %c0_i32_0 : i32, i32
  }
  func.func @transform_5(%arg0: i32, %arg1: i32) -> (i32, i32) {
    %c0_i32 = arith.constant 0 : i32
    %c0_i32_0 = arith.constant 0 : i32
    %c0_i32_1 = arith.constant 0 : i32
    return %c0_i32, %c0_i32_0 : i32, i32
  }
  func.func @transform_6(%arg0: i32, %arg1: i32) -> (i32, i32) {
    %c0_i32 = arith.constant 0 : i32
    %c0_i32_0 = arith.constant 0 : i32
    return %arg0, %c0_i32 : i32, i32
  }
}

</mosaic_0001>

<bundles_post_ra>
// kernel: tpu_custom_call.1
= control target key start
LH: loop header
LB: loop body
LE: loop exit
PB: predicated region body
PF: predicated region fallthrough
CT: control target
= control target key end

     0   :  { %11 = vsyncpa [#allocation6], 0  ;;  %s2544_s0 = inlined_call_operand.vmem [shape: bf16[1,64,16], index: 0, kind: input, shape index: {}]   ;;  %s2545_s1 = inlined_call_operand.vmem [shape: bf16[16,512], index: 1, kind: input, shape index: {}]   ;;  %s2546_s2 = inlined_call_operand.vmem [shape: f32[1,512], index: 2, kind: input, shape index: {}]   ;;  %s2547_s3 = inlined_call_operand.hbm [shape: bf16[128,512], index: 3, kind: input, shape index: {}]   ;;  %s2548_s4 = inlined_call_operand.hbm [shape: bf16[128,128], index: 4, kind: input, shape index: {}]   ;;  %s2549_s5 = inlined_call_operand.vmem [shape: f32[1,128], index: 5, kind: input, shape index: {}]   ;;  %s2550_s6 = inlined_call_operand.hbm [shape: f32[8,128], index: 6, kind: output, shape index: {}]  }
   0x1   :  { %12 = vsyncpa [#allocation9], 0 }
   0x2   :  { %13 = vsyncpa [#allocation7], 0  ;;  %s1902_s21 = smov [#allocation5]   ;;  %s1830_s25 = scalar_lea.hbm %s2547_s3, 4096 }
   0x3   :  { %s25_s22 = sshll.u32 %s1902_s21, 4  ;;  %p1831_p0 = scmp.ne.s32.totalorder %s2547_s3, %s1830_s25  ;;  %s26_s22 = int_to_ptr.vmem [resolvable:$true] %s25_s22 }
   0x4   :  { %p1834_p1 = scmp.lt.u32.totalorder %s1830_s25, %s2547_s3 }
   0x6   :  { %p1836_p2 = pnand %p1834_p1, %p1831_p0 }
   0x8   :  { %1839 = shalt.err (!%p1836_p2)
}
   0x9   :  { %s1840_s30 = scalar_lea.vmem %s26_s22, 4096  ;;  %p1845_p4 = scmp.lt.s32.totalorder %s26_s22, %s26_s22 }
   0xa   :  { %p1841_p3 = scmp.ne.s32.totalorder %s26_s22, %s1840_s30  ;;  %p1846_p5 = scmp.lt.s32.totalorder %s1840_s30, %s1840_s30 }
   0xc   :  { %p1847_p6 = por %p1846_p5, %p1845_p4 }
   0xe   :  { %p1848_p7 = pnand %p1847_p6, %p1841_p3 }
  0x10   :  { %1851 = shalt.err (!%p1848_p7)
}
  0x11   :  { %s1903_s7 = smov 256   ;;  %s1904_s8 = smov 16  }
  0x12   :  { %31 = dma.hbm_to_vmem [thread:$0]  %s2547_s3, 4096, %s26_s22, [#allocation6], %s1903_s7, %s1903_s7, %s1904_s8  }
  0x13   :  { %s1905_s11 = smov [#allocation8]   ;;  %s1852_s15 = scalar_lea.hbm %s2548_s4, 1024 }
  0x14   :  { %s37_s12 = sshll.u32 %s1905_s11, 4  ;;  %p1853_p8 = scmp.ne.s32.totalorder %s2548_s4, %s1852_s15  ;;  %s38_s12 = int_to_ptr.vmem [resolvable:$true] %s37_s12 }
  0x15   :  { %p1856_p9 = scmp.lt.u32.totalorder %s1852_s15, %s2548_s4 }
  0x17   :  { %p1858_p10 = pnand %p1856_p9, %p1853_p8 }
  0x19   :  { %1861 = shalt.err (!%p1858_p10)
}
  0x1a   :  { %s1862_s20 = scalar_lea.vmem %s38_s12, 1024  ;;  %p1867_p12 = scmp.lt.s32.totalorder %s38_s12, %s38_s12 }
  0x1b   :  { %p1863_p11 = scmp.ne.s32.totalorder %s38_s12, %s1862_s20  ;;  %p1868_p13 = scmp.lt.s32.totalorder %s1862_s20, %s1862_s20 }
  0x1d   :  { %p1869_p0 = por %p1868_p13, %p1867_p12 }
  0x1f   :  { %p1870_p1 = pnand %p1869_p0, %p1863_p11 }
  0x21   :  { %1873 = shalt.err (!%p1870_p1)
}
  0x22   :  { %s1906_s3 = smov 64   ;;  %s1907_s21 = smov 4  }
  0x23   :  { %43 = dma.hbm_to_vmem [thread:$0]  %s2548_s4, 1024, %s38_s12, [#allocation9], %s1906_s3, %s1906_s3, %s1907_s21  }
  0x24   :  { %1896 = dma.done.wait [#allocation6], 4096  }
  0x25   :  { %1897 = vsyncadd [#allocation6], 4294963200 }
  0x26   :  { %1898 = dma.done.wait [#allocation9], 1024  }
  0x27   :  { %1899 = vsyncadd [#allocation9], 4294966272  ;;  %v2551_v0 = vmov 0   ;;  %v1652_v1 = vld [vmem:[%s2545_s1 + $0x4] ss:$16 sps:$4 sm:$0xff]   ;;  %vm133_vm0 = vcmask 130048   ;;  %v73_v42 = vlaneseq }
  0x28   :  { %178 = vmatprep.mubr.bf16.mxu0 %v2551_v0  ;;  %251 = vmatprep.mubr.bf16.mxu1 %v2551_v0  ;;  %v1654_v2 = vld [vmem:[%s2545_s1 + $0xc] ss:$16 sps:$4 sm:$0xff]   ;;  %v1656_v3 = vld [vmem:[%s2545_s1] ss:$16 sps:$4 sm:$0xff]   ;;  %v1657_v4 = vld [vmem:[%s2545_s1 + $0x8] ss:$16 sps:$4 sm:$0xff]  }
  0x29   :  { %146 = vmatprep.subr.bf16.mxu0 %v1652_v1  ;;  %219 = vmatprep.subr.bf16.mxu1 %v1654_v2  ;;  %v1658_v5 = vld [vmem:[%s2544_s0] sm:$0xff]   ;;  %v1991_v7 = vld [vmem:[#allocation5 + $0xc] ss:$16 sps:$4 sm:$0xff]   ;;  %v1996_v9 = vld [vmem:[#allocation5 + $0x8] ss:$16 sps:$4 sm:$0xff]   ;;  %v1909_v41 = vmov 0.0|0.0  }
  0x2a   :  { %147 = vmatpush1.bf16.msra.mxu0 %v1656_v3  ;;  %220 = vmatpush1.bf16.msra.mxu1 %v1657_v4  ;;  %v1989_v6 = vld [vmem:[#allocation5 + $0x4] ss:$16 sps:$4 sm:$0xff]   ;;  %v1993_v8 = vld [vmem:[#allocation5] ss:$16 sps:$4 sm:$0xff]   ;;  %v2004_v11 = vld [vmem:[#allocation5 + $0x2c] ss:$16 sps:$4 sm:$0xff]  }
  0x2b   :  { %526 = vmatprep.subr.bf16.mxu0 %v1989_v6  ;;  %v2000_v10 = vld [vmem:[#allocation5 + $0x24] ss:$16 sps:$4 sm:$0xff]   ;;  %567 = vmatprep.subr.bf16.mxu1 %v1991_v7  ;;  %v2006_v12 = vld [vmem:[#allocation5 + $0x20] ss:$16 sps:$4 sm:$0xff]   ;;  %v2008_v13 = vld [vmem:[#allocation5 + $0x28] ss:$16 sps:$4 sm:$0xff]  }
  0x2c   :  { %v1671_v14 = vld [vmem:[%s2544_s0 + $0x8] sm:$0xff]   ;;  %v2017_v15 = vld [vmem:[#allocation5 + $0x44] ss:$16 sps:$4 sm:$0xff]   ;;  %v2023_v17 = vld [vmem:[#allocation5 + $0x40] ss:$16 sps:$4 sm:$0xff]   ;;  %v74_v43 = vshrl.u32 %v73_v42, 7 }
  0x2d   :  { %1563 = vmatmul.mubr.msk.bf16.vlgmr.msra.gmra.mrb[0].mxu0 %vm133_vm0, %v1658_v5  ;;  %1567 = vmatmul.mubr.msk.bf16.vlgmr.msra.gmra.mrb[0].mxu1 %vm133_vm0, %v1658_v5  ;;  %v2020_v16 = vld [vmem:[#allocation5 + $0x4c] ss:$16 sps:$4 sm:$0xff]   ;;  %v2025_v18 = vld [vmem:[#allocation5 + $0x48] ss:$16 sps:$4 sm:$0xff]   ;;  %v2029_v19 = vld [vmem:[#allocation5 + $0x64] ss:$16 sps:$4 sm:$0xff]  }
  0x2e   :  { %527 = vmatpush1.bf16.msra.mxu0 %v1993_v8  ;;  %568 = vmatpush1.bf16.msra.mxu1 %v1996_v9  ;;  %v2032_v20 = vld [vmem:[#allocation5 + $0x6c] ss:$16 sps:$4 sm:$0xff]   ;;  %v2036_v21 = vld [vmem:[#allocation5 + $0x60] ss:$16 sps:$4 sm:$0xff]   ;;  %v2039_v22 = vld [vmem:[#allocation5 + $0x68] ss:$16 sps:$4 sm:$0xff]  }
  0x2f   :  { %528 = vmatprep.subr.bf16.mxu0 %v2000_v10  ;;  %569 = vmatprep.subr.bf16.mxu1 %v2004_v11  ;;  %v2044_v23 = vld [vmem:[#allocation5 + $0x84] ss:$16 sps:$4 sm:$0xff]   ;;  %v2048_v24 = vld [vmem:[#allocation5 + $0x8c] ss:$16 sps:$4 sm:$0xff]   ;;  %v2054_v26 = vld [vmem:[#allocation5 + $0x80] ss:$16 sps:$4 sm:$0xff]  }
  0x30   :  { %188 = vmatprep.mubr.bf16.mxu0 %v2551_v0  ;;  %261 = vmatprep.mubr.bf16.mxu1 %v2551_v0  ;;  %v1684_v25 = vld [vmem:[%s2544_s0 + $0x10] sm:$0xff]   ;;  %v2058_v27 = vld [vmem:[#allocation5 + $0x88] ss:$16 sps:$4 sm:$0xff]   ;;  %v2063_v29 = vld [vmem:[#allocation5 + $0xac] ss:$16 sps:$4 sm:$0xff]   ;;  %v83_v44 = vsub.s32 2, %v74_v43 }
  0x31   :  { %v2060_v28 = vld [vmem:[#allocation5 + $0xa4] ss:$16 sps:$4 sm:$0xff]   ;;  %v2068_v30 = vld [vmem:[#allocation5 + $0xa0] ss:$16 sps:$4 sm:$0xff]   ;;  %v2070_v31 = vld [vmem:[#allocation5 + $0xa8] ss:$16 sps:$4 sm:$0xff]  }
  0x32   :  { %529 = vmatpush1.bf16.msra.mxu0 %v2006_v12  ;;  %570 = vmatpush1.bf16.msra.mxu1 %v2008_v13  ;;  %v1697_v32 = vld [vmem:[%s2544_s0 + $0x18] sm:$0xff]   ;;  %v2078_v33 = vld [vmem:[#allocation5 + $0xc4] ss:$16 sps:$4 sm:$0xff]   ;;  %v2084_v35 = vld [vmem:[#allocation5 + $0xc0] ss:$16 sps:$4 sm:$0xff]   ;;  %v87_v45 = vsub.s32 3, %v74_v43 }
  0x33   :  { %530 = vmatprep.subr.bf16.mxu0 %v2017_v15  ;;  %571 = vmatprep.subr.bf16.mxu1 %v2020_v16  ;;  %v2082_v34 = vld [vmem:[#allocation5 + $0xcc] ss:$16 sps:$4 sm:$0xff]   ;;  %v2086_v36 = vld [vmem:[#allocation5 + $0xc8] ss:$16 sps:$4 sm:$0xff]   ;;  %v2088_v37 = vld [vmem:[#allocation5 + $0xe4] ss:$16 sps:$4 sm:$0xff]  }
  0x34   :  { %v2091_v38 = vld [vmem:[#allocation5 + $0xec] ss:$16 sps:$4 sm:$0xff]   ;;  %v2096_v39 = vld [vmem:[#allocation5 + $0xe0] ss:$16 sps:$4 sm:$0xff]   ;;  %v2104_v40 = vld [vmem:[#allocation5 + $0xe8] ss:$16 sps:$4 sm:$0xff]  }
  0x35   :  { %1564 = vmatmul.mubr.msk.bf16.gmra.mrb[4].mxu0 %vm133_vm0, %v1671_v14  ;;  %1568 = vmatmul.mubr.msk.bf16.gmra.mrb[4].mxu1 %vm133_vm0, %v1671_v14  ;;  %v75_v46 = vsub.s32 0, %v74_v43  ;;  %v71_v47 = vld [vmem:[%s2546_s2] sm:$0xf]  ;;  %v79_v48 = vsub.s32 1, %v74_v43  ;;  %vm1911_vm1 = vmmov 0   ;;  %s1912_s16 = smov [#allocation10]  }
  0x36   :  { %531 = vmatpush1.bf16.msra.mxu0 %v2023_v17  ;;  %198 = vmatprep.mubr.bf16.mxu0 %v2551_v0  ;;  %v2149_v49 = vrot.slane %v71_v47, %v83_v44  ;;  %v2155_v52 = vrot.slane %v71_v47, %v87_v45  ;;  %s1538_s17 = sshll.u32 %s1912_s16, 4  ;;  %s1539_s17 = int_to_ptr.vmem [resolvable:$true] %s1538_s17 }
  0x37   :  { %572 = vmatpush1.bf16.msra.mxu1 %v2025_v18  ;;  %532 = vmatprep.subr.bf16.mxu0 %v2029_v19  ;;  %v76_v53 = vrot.slane %v71_v47, %v75_v46  ;;  %v80_v56 = vrot.slane %v71_v47, %v79_v48  ;;  %s1874_s18 = scalar_lea.vmem %s1539_s17, 128  ;;  %p1879_p3 = scmp.lt.s32.totalorder %s1539_s17, %s1539_s17 }
  0x38   :  { %573 = vmatprep.subr.bf16.mxu1 %v2032_v20  ;;  %271 = vmatprep.mubr.bf16.mxu1 %v2551_v0  ;;  %p1875_p2 = scmp.ne.s32.totalorder %s1539_s17, %s1874_s18  ;;  %p1880_p4 = scmp.lt.s32.totalorder %s1874_s18, %s1874_s18 }
  0x3a   :  { %533 = vmatpush1.bf16.msra.mxu0 %v2036_v21  ;;  %p1881_p5 = por %p1880_p4, %p1879_p3 }
  0x3b   :  { %574 = vmatpush1.bf16.msra.mxu1 %v2039_v22  ;;  %534 = vmatprep.subr.bf16.mxu0 %v2044_v23 }
  0x3c   :  { %575 = vmatprep.subr.bf16.mxu1 %v2048_v24  ;;  %p1882_p6 = pnand %p1881_p5, %p1875_p2 }
  0x3d   :  { %1565 = vmatmul.mubr.msk.bf16.gmra.mrb[8].mxu0 %vm133_vm0, %v1684_v25  ;;  %1569 = vmatmul.mubr.msk.bf16.gmra.mrb[8].mxu1 %vm133_vm0, %v1684_v25 }
  0x3e   :  { %535 = vmatpush1.bf16.msra.mxu0 %v2054_v26  ;;  %208 = vmatprep.mubr.bf16.mxu0 %v2551_v0 }
  0x3f   :  { %576 = vmatpush1.bf16.msra.mxu1 %v2058_v27  ;;  %536 = vmatprep.subr.bf16.mxu0 %v2060_v28 }
  0x40   :  { %577 = vmatprep.subr.bf16.mxu1 %v2063_v29  ;;  %281 = vmatprep.mubr.bf16.mxu1 %v2551_v0 }
  0x42   :  { %537 = vmatpush1.bf16.msra.mxu0 %v2068_v30 }
  0x43   :  { %578 = vmatpush1.bf16.msra.mxu1 %v2070_v31  ;;  %538 = vmatprep.subr.bf16.mxu0 %v2078_v33 }
  0x44   :  { %579 = vmatprep.subr.bf16.mxu1 %v2082_v34 }
  0x45   :  { %1566 = vmatmul.mubr.msk.bf16.gmra.mrb[12].mxu0 %vm133_vm0, %v1697_v32  ;;  %1570 = vmatmul.mubr.msk.bf16.gmra.mrb[12].mxu1 %vm133_vm0, %v1697_v32 }
  0x46   :  { %539 = vmatpush1.bf16.msra.mxu0 %v2084_v35  ;;  %558 = vmatprep.mubr.bf16.mxu0 %v2551_v0 }
  0x47   :  { %580 = vmatpush1.bf16.msra.mxu1 %v2086_v36  ;;  %540 = vmatprep.subr.bf16.mxu0 %v2088_v37 }
  0x48   :  { %581 = vmatprep.subr.bf16.mxu1 %v2091_v38  ;;  %599 = vmatprep.mubr.bf16.mxu1 %v2551_v0 }
  0x4a   :  { %541 = vmatpush1.bf16.msra.mxu0 %v2096_v39 }
  0x4b   :  { %582 = vmatpush1.bf16.msra.mxu1 %v2104_v40  ;;  %638 = vmatprep.subr.bf16.mxu0 %v1989_v6 }
  0x4c   :  { %679 = vmatprep.subr.bf16.mxu1 %v1991_v7 }
  0x4d   :  { %559 = vmatmul.mubr.bf16.vlgmr.msra.gmra.mrb[16].mxu0 %v1909_v41 }
  0x4e   :  { %600 = vmatmul.mubr.bf16.vlgmr.msra.gmra.mrb[16].mxu1 %v1909_v41  ;;  %639 = vmatpush1.bf16.msra.mxu0 %v1993_v8 }
  0x4f   :  { %680 = vmatpush1.bf16.msra.mxu1 %v1996_v9  ;;  %640 = vmatprep.subr.bf16.mxu0 %v2000_v10 }
  0x50   :  { %681 = vmatprep.subr.bf16.mxu1 %v2004_v11  ;;  %670 = vmatprep.mubr.bf16.mxu0 %v2551_v0 }
  0x51   :  { %711 = vmatprep.mubr.bf16.mxu1 %v2551_v0 }
  0x52   :  { %641 = vmatpush1.bf16.msra.mxu0 %v2006_v12 }
  0x53   :  { %682 = vmatpush1.bf16.msra.mxu1 %v2008_v13  ;;  %642 = vmatprep.subr.bf16.mxu0 %v2017_v15 }
  0x54   :  { %683 = vmatprep.subr.bf16.mxu1 %v2020_v16 }
  0x56   :  { %643 = vmatpush1.bf16.msra.mxu0 %v2023_v17 }
  0x57   :  { %684 = vmatpush1.bf16.msra.mxu1 %v2025_v18  ;;  %644 = vmatprep.subr.bf16.mxu0 %v2029_v19 }
  0x58   :  { %685 = vmatprep.subr.bf16.mxu1 %v2032_v20 }
  0x5a   :  { %645 = vmatpush1.bf16.msra.mxu0 %v2036_v21 }
  0x5b   :  { %686 = vmatpush1.bf16.msra.mxu1 %v2039_v22  ;;  %646 = vmatprep.subr.bf16.mxu0 %v2044_v23 }
  0x5c   :  { %687 = vmatprep.subr.bf16.mxu1 %v2048_v24 }
  0x5e   :  { %647 = vmatpush1.bf16.msra.mxu0 %v2054_v26 }
  0x5f   :  { %688 = vmatpush1.bf16.msra.mxu1 %v2058_v27  ;;  %648 = vmatprep.subr.bf16.mxu0 %v2060_v28 }
  0x60   :  { %689 = vmatprep.subr.bf16.mxu1 %v2063_v29 }
  0x62   :  { %649 = vmatpush1.bf16.msra.mxu0 %v2068_v30 }
  0x63   :  { %690 = vmatpush1.bf16.msra.mxu1 %v2070_v31  ;;  %650 = vmatprep.subr.bf16.mxu0 %v2078_v33 }
  0x64   :  { %691 = vmatprep.subr.bf16.mxu1 %v2082_v34 }
  0x66   :  { %651 = vmatpush1.bf16.msra.mxu0 %v2084_v35 }
  0x67   :  { %692 = vmatpush1.bf16.msra.mxu1 %v2086_v36  ;;  %652 = vmatprep.subr.bf16.mxu0 %v2088_v37 }
  0x68   :  { %693 = vmatprep.subr.bf16.mxu1 %v2091_v38 }
  0x6a   :  { %653 = vmatpush1.bf16.msra.mxu0 %v2096_v39 }
  0x6b   :  { %694 = vmatpush1.bf16.msra.mxu1 %v2104_v40  ;;  %750 = vmatprep.subr.bf16.mxu0 %v1989_v6 }
  0x6c   :  { %791 = vmatprep.subr.bf16.mxu1 %v1991_v7 }
 0x100   :  { %v2151_v50 = vpop.f32.mrb[0].mxu0  ;;  %v2153_v51 = vpop.f32.mrb[0].mxu1 }
 0x101   :  { %v182_v54 = vpop.f32.mrb[1].mxu0  ;;  %v255_v55 = vpop.f32.mrb[1].mxu1 }
 0x102   :  { %v184_v57 = vpop.f32.mrb[2].mxu0  ;;  %v257_v58 = vpop.f32.mrb[2].mxu1 }
 0x103   :  { %v2157_v59 = vadd.f32 %v184_v57, %v76_v53  ;;  %v186_v60 = vpop.f32.mrb[3].mxu0  ;;  %v2160_v61 = vadd.f32 %v257_v58, %v2149_v49  ;;  %v259_v62 = vpop.f32.mrb[3].mxu1 }
 0x104   :  { %v2162_v63 = vadd.f32 %v186_v60, %v80_v56  ;;  %v2165_v1 = vadd.f32 %v259_v62, %v2155_v52 }
 0x108   :  { %v190_v2 = vpop.f32.mrb[4].mxu0  ;;  %v263_v3 = vpop.f32.mrb[4].mxu1 }
 0x109   :  { %v2167_v4 = vadd.f32 %v190_v2, %v76_v53  ;;  %v192_v5 = vpop.f32.mrb[5].mxu0  ;;  %v2170_v14 = vadd.f32 %v263_v3, %v2149_v49  ;;  %v265_v25 = vpop.f32.mrb[5].mxu1 }
 0x10a   :  { %v2172_v32 = vadd.f32 %v192_v5, %v80_v56  ;;  %v194_v41 = vpop.f32.mrb[6].mxu0  ;;  %v2175_v42 = vadd.f32 %v265_v25, %v2155_v52  ;;  %v267_v43 = vpop.f32.mrb[6].mxu1 }
 0x10b   :  { %v2177_v44 = vadd.f32 %v194_v41, %v76_v53  ;;  %v196_v45 = vpop.f32.mrb[7].mxu0  ;;  %v2180_v46 = vadd.f32 %v267_v43, %v2149_v49  ;;  %v269_v47 = vpop.f32.mrb[7].mxu1 }
 0x10c   :  { %2553 = vst [vmem:[#allocation14_spill] sm:$0xff] %v2175_v42  ;;  %v2182_v48 = vadd.f32 %v196_v45, %v80_v56  ;;  %v2185_v57 = vadd.f32 %v269_v47, %v2155_v52 }
 0x10d   :  { %2554 = vst [vmem:[#allocation15_spill] sm:$0xff] %v2177_v44  ;;  %2555 = vst [vmem:[#allocation16_spill] sm:$0xff] %v2180_v46 }
 0x10e   :  { %2556 = vst [vmem:[#allocation17_spill] sm:$0xff] %v2182_v48  ;;  %2557 = vst [vmem:[#allocation18_spill] sm:$0xff] %v2185_v57 }
 0x110   :  { %v200_v58 = vpop.f32.mrb[8].mxu0  ;;  %v273_v60 = vpop.f32.mrb[8].mxu1 }
 0x111   :  { %v2187_v62 = vadd.f32 %v200_v58, %v76_v53  ;;  %v202_v2 = vpop.f32.mrb[9].mxu0  ;;  %v2190_v3 = vadd.f32 %v273_v60, %v2149_v49  ;;  %v275_v5 = vpop.f32.mrb[9].mxu1 }
 0x112   :  { %v2192_v25 = vadd.f32 %v202_v2, %v80_v56  ;;  %v204_v41 = vpop.f32.mrb[10].mxu0  ;;  %v2195_v43 = vadd.f32 %v275_v5, %v2155_v52  ;;  %v277_v45 = vpop.f32.mrb[10].mxu1 }
 0x113   :  { %2558 = vst [vmem:[#allocation19_spill] sm:$0xff] %v2187_v62  ;;  %2559 = vst [vmem:[#allocation20_spill] sm:$0xff] %v2190_v3  ;;  %v2197_v0 = vadd.f32 %v204_v41, %v76_v53  ;;  %v206_v47 = vpop.f32.mrb[11].mxu0  ;;  %v2200_v57 = vadd.f32 %v277_v45, %v2149_v49  ;;  %v279_v58 = vpop.f32.mrb[11].mxu1 }
 0x114   :  { %2560 = vst [vmem:[#allocation21_spill] sm:$0xff] %v2192_v25  ;;  %2561 = vst [vmem:[#allocation22_spill] sm:$0xff] %v2195_v43  ;;  %v2202_v62 = vadd.f32 %v206_v47, %v80_v56  ;;  %v2205_v60 = vadd.f32 %v279_v58, %v2155_v52 }
 0x115   :  { %2562 = vst [vmem:[#allocation23_spill] sm:$0xff] %v2197_v0  ;;  %2563 = vst [vmem:[#allocation24_spill] sm:$0xff] %v2200_v57 }
 0x116   :  { %2564 = vst [vmem:[#allocation25_spill] sm:$0xff] %v2202_v62  ;;  %2565 = vst [vmem:[#allocation26_spill] sm:$0xff] %v2205_v60 }
 0x118   :  { %v210_v3 = vpop.f32.mrb[12].mxu0  ;;  %v283_v2 = vpop.f32.mrb[12].mxu1 }
 0x119   :  { %v2207_v25 = vadd.f32 %v210_v3, %v76_v53  ;;  %v212_v48 = vpop.f32.mrb[13].mxu0  ;;  %v2210_v5 = vadd.f32 %v283_v2, %v2149_v49  ;;  %v285_v41 = vpop.f32.mrb[13].mxu1 }
 0x11a   :  { %v2212_v0 = vadd.f32 %v212_v48, %v80_v56  ;;  %v214_v43 = vpop.f32.mrb[14].mxu0  ;;  %v2215_v45 = vadd.f32 %v285_v41, %v2155_v52  ;;  %v287_v47 = vpop.f32.mrb[14].mxu1  ;;  %v181_v48 = vadd.f32 %v2151_v50, %v76_v53  ;;  %v254_v41 = vadd.f32 %v2153_v51, %v2149_v49 }
 0x11b   :  { %2566 = vst [vmem:[#allocation27_spill] sm:$0xff] %v2207_v25  ;;  %2567 = vst [vmem:[#allocation28_spill] sm:$0xff] %v2210_v5  ;;  %v2217_v62 = vadd.f32 %v214_v43, %v76_v53  ;;  %v216_v58 = vpop.f32.mrb[15].mxu0  ;;  %v2220_v60 = vadd.f32 %v287_v47, %v2149_v49  ;;  %v289_v3 = vpop.f32.mrb[15].mxu1  ;;  %v256_v43 = vadd.f32 %v255_v55, %v2155_v52 }
 0x11c   :  { %2568 = vst [vmem:[#allocation29_spill] sm:$0xff] %v2212_v0  ;;  %2569 = vst [vmem:[#allocation30_spill] sm:$0xff] %v2215_v45  ;;  %v2222_v25 = vadd.f32 %v216_v58, %v80_v56  ;;  %v2225_v2 = vadd.f32 %v289_v3, %v2155_v52  ;;  %v183_v0 = vadd.f32 %v182_v54, %v80_v56 }
 0x11d   :  { %2570 = vst [vmem:[#allocation31_spill] sm:$0xff] %v2217_v62  ;;  %2571 = vst [vmem:[#allocation32_spill] sm:$0xff] %v2220_v60 }
 0x11e   :  { %2572 = vst [vmem:[#allocation33_spill] sm:$0xff] %v2222_v25  ;;  %2573 = vst [vmem:[#allocation34_spill] sm:$0xff] %v2225_v2 }
 0x120   :  { %v560_v45 = vpop.f32.mrb[16].mxu0 }
 0x121   :  { %v608_v62 = vadd.f32 %v560_v45, %v181_v48  ;;  %v601_v5 = vpop.f32.mrb[16].mxu1  ;;  %v562_v57 = vpop.f32.mrb[17].mxu0 }
 0x122   :  { %v610_v47 = vadd.f32 %v601_v5, %v254_v41  ;;  %v609_v60 = vadd.f32 %v562_v57, %v183_v0  ;;  %v603_v46 = vpop.f32.mrb[17].mxu1  ;;  %v564_v58 = vpop.f32.mrb[18].mxu0 }
 0x123   :  { %v612_v25 = vmul.f32 0.5, %v608_v62  ;;  %v611_v44 = vadd.f32 %v603_v46, %v256_v43  ;;  %v565_v3 = vpop.f32.mrb[19].mxu0  ;;  %v605_v2 = vpop.f32.mrb[18].mxu1 }
 0x124   :  { %v616_v42 = vmul.f32 0.5, %v609_v60  ;;  %v606_v50 = vpop.f32.mrb[19].mxu1  ;;  %v2574_v2 = vmov 0  }
 0x125   :  { %1718 = vtanh.f32 %v612_v25  ;;  %v621_v49 = vmul.f32 0.5, %v611_v44 }
 0x126   :  { %1720 = vtanh.f32 %v616_v42 }
 0x127   :  { %1722 = vtanh.f32 %v610_v47 }
 0x128   :  { %1724 = vtanh.f32 %v621_v49 }
 0x12f   :  { %v1719_v51 = vpop.eup %1718 }
 0x130   :  { %v1721_v53 = vpop.eup %1720  ;;  %v614_v52 = vmul.f32 0.5, %v1719_v51 }
 0x131   :  { %v618_v54 = vmul.f32 0.5, %v1721_v53  ;;  %v1723_v56 = vpop.eup %1722 }
 0x132   :  { %v615_v55 = vadd.f32 0.5, %v614_v52  ;;  %v1725_v46 = vpop.eup %1724 }
 0x133   :  { %v619_v0 = vadd.f32 0.5, %v618_v54  ;;  %v623_v60 = vmul.f32 0.5, %v1725_v46 }
 0x134   :  { %v626_v57 = vmul.f32 %v1723_v56, %v615_v55 }
 0x135   :  { %v625_v5 = vmul.f32 0.0, %v619_v0  ;;  %v624_v25 = vadd.f32 0.5, %v623_v60 }
 0x137   :  { %v2231_v62 = vadd.f32 %v626_v57, %v625_v5 }
 0x139   :  { %1726 = vtanh.f32 %v2231_v62 }
 0x143   :  { %v1727_v42 = vpop.eup %1726 }
 0x144   :  { %v629_v45 = vmul.f32 %v1727_v42, %v624_v25 }
 0x146   :  { %v637_v44 = vpack.c.bf16 %v629_v45, %v629_v45 }
 0x148   :  { %671 = vmatmul.mubr.bf16.vlgmr.msra.gmra.mrb[20].mxu0 %v637_v44  ;;  %712 = vmatmul.mubr.bf16.vlgmr.msra.gmra.mrb[20].mxu1 %v637_v44 }
 0x149   :  { %751 = vmatpush1.bf16.msra.mxu0 %v1993_v8  ;;  %792 = vmatpush1.bf16.msra.mxu1 %v1996_v9 }
 0x14a   :  { %752 = vmatprep.subr.bf16.mxu0 %v2000_v10  ;;  %793 = vmatprep.subr.bf16.mxu1 %v2004_v11 }
 0x14b   :  { %782 = vmatprep.mubr.bf16.mxu0 %v2574_v2  ;;  %823 = vmatprep.mubr.bf16.mxu1 %v2574_v2 }
 0x14d   :  { %753 = vmatpush1.bf16.msra.mxu0 %v2006_v12  ;;  %794 = vmatpush1.bf16.msra.mxu1 %v2008_v13 }
 0x14e   :  { %754 = vmatprep.subr.bf16.mxu0 %v2017_v15  ;;  %795 = vmatprep.subr.bf16.mxu1 %v2020_v16 }
 0x151   :  { %755 = vmatpush1.bf16.msra.mxu0 %v2023_v17  ;;  %796 = vmatpush1.bf16.msra.mxu1 %v2025_v18 }
 0x152   :  { %756 = vmatprep.subr.bf16.mxu0 %v2029_v19  ;;  %797 = vmatprep.subr.bf16.mxu1 %v2032_v20 }
 0x155   :  { %757 = vmatpush1.bf16.msra.mxu0 %v2036_v21  ;;  %798 = vmatpush1.bf16.msra.mxu1 %v2039_v22 }
 0x156   :  { %758 = vmatprep.subr.bf16.mxu0 %v2044_v23  ;;  %799 = vmatprep.subr.bf16.mxu1 %v2048_v24 }
 0x159   :  { %759 = vmatpush1.bf16.msra.mxu0 %v2054_v26  ;;  %800 = vmatpush1.bf16.msra.mxu1 %v2058_v27 }
 0x15a   :  { %760 = vmatprep.subr.bf16.mxu0 %v2060_v28  ;;  %801 = vmatprep.subr.bf16.mxu1 %v2063_v29 }
 0x15d   :  { %761 = vmatpush1.bf16.msra.mxu0 %v2068_v30  ;;  %802 = vmatpush1.bf16.msra.mxu1 %v2070_v31 }
 0x15e   :  { %762 = vmatprep.subr.bf16.mxu0 %v2078_v33  ;;  %803 = vmatprep.subr.bf16.mxu1 %v2082_v34 }
 0x161   :  { %763 = vmatpush1.bf16.msra.mxu0 %v2084_v35  ;;  %804 = vmatpush1.bf16.msra.mxu1 %v2086_v36 }
 0x162   :  { %764 = vmatprep.subr.bf16.mxu0 %v2088_v37  ;;  %805 = vmatprep.subr.bf16.mxu1 %v2091_v38 }
 0x165   :  { %765 = vmatpush1.bf16.msra.mxu0 %v2096_v39  ;;  %806 = vmatpush1.bf16.msra.mxu1 %v2104_v40 }
 0x166   :  { %862 = vmatprep.subr.bf16.mxu0 %v1989_v6  ;;  %903 = vmatprep.subr.bf16.mxu1 %v1991_v7 }
 0x21b   :  { %v672_v48 = vpop.f32.mrb[20].mxu0  ;;  %v713_v41 = vpop.f32.mrb[20].mxu1 }
 0x21c   :  { %v720_v43 = vadd.f32 %v672_v48, %v2157_v59  ;;  %v722_v47 = vadd.f32 %v713_v41, %v2160_v61  ;;  %v674_v58 = vpop.f32.mrb[21].mxu0  ;;  %v715_v3 = vpop.f32.mrb[21].mxu1 }
 0x21d   :  { %v721_v50 = vadd.f32 %v674_v58, %v2162_v63  ;;  %v723_v49 = vadd.f32 %v715_v3, %v2165_v1  ;;  %v676_v51 = vpop.f32.mrb[22].mxu0  ;;  %v717_v53 = vpop.f32.mrb[22].mxu1 }
 0x21e   :  { %v724_v52 = vmul.f32 0.5, %v720_v43  ;;  %v677_v54 = vpop.f32.mrb[23].mxu0  ;;  %v718_v55 = vpop.f32.mrb[23].mxu1 }
 0x21f   :  { %v728_v56 = vmul.f32 0.5, %v721_v50  ;;  %v733_v0 = vmul.f32 0.5, %v723_v49 }
 0x220   :  { %1728 = vtanh.f32 %v724_v52  ;;  %v2575_v52 = vld [vmem:[#allocation14_spill] sm:$0xff] }
 0x221   :  { %1730 = vtanh.f32 %v728_v56 }
 0x222   :  { %1732 = vtanh.f32 %v722_v47 }
 0x223   :  { %1734 = vtanh.f32 %v733_v0 }
 0x22a   :  { %v1729_v57 = vpop.eup %1728 }
 0x22b   :  { %v1731_v59 = vpop.eup %1730  ;;  %v726_v5 = vmul.f32 0.5, %v1729_v57 }
 0x22c   :  { %v730_v61 = vmul.f32 0.5, %v1731_v59  ;;  %v1733_v60 = vpop.eup %1732 }
 0x22d   :  { %v727_v46 = vadd.f32 0.5, %v726_v5  ;;  %v1735_v45 = vpop.eup %1734 }
 0x22e   :  { %v731_v63 = vadd.f32 0.5, %v730_v61  ;;  %v735_v44 = vmul.f32 0.5, %v1735_v45 }
 0x22f   :  { %v738_v25 = vmul.f32 %v1733_v60, %v727_v46 }
 0x230   :  { %v737_v1 = vmul.f32 %v731_v63, %v2231_v62  ;;  %v736_v48 = vadd.f32 0.5, %v735_v44 }
 0x232   :  { %v2273_v42 = vadd.f32 %v738_v25, %v737_v1 }
 0x234   :  { %1736 = vtanh.f32 %v2273_v42 }
 0x23e   :  { %v1737_v41 = vpop.eup %1736 }
 0x23f   :  { %v741_v43 = vmul.f32 %v1737_v41, %v736_v48 }
 0x241   :  { %v749_v47 = vpack.c.bf16 %v741_v43, %v741_v43 }
 0x243   :  { %783 = vmatmul.mubr.bf16.vlgmr.msra.gmra.mrb[24].mxu0 %v749_v47  ;;  %824 = vmatmul.mubr.bf16.vlgmr.msra.gmra.mrb[24].mxu1 %v749_v47 }
 0x244   :  { %863 = vmatpush1.bf16.msra.mxu0 %v1993_v8  ;;  %904 = vmatpush1.bf16.msra.mxu1 %v1996_v9 }
 0x245   :  { %864 = vmatprep.subr.bf16.mxu0 %v2000_v10  ;;  %905 = vmatprep.subr.bf16.mxu1 %v2004_v11 }
 0x246   :  { %894 = vmatprep.mubr.bf16.mxu0 %v2574_v2  ;;  %935 = vmatprep.mubr.bf16.mxu1 %v2574_v2 }
 0x248   :  { %865 = vmatpush1.bf16.msra.mxu0 %v2006_v12  ;;  %906 = vmatpush1.bf16.msra.mxu1 %v2008_v13 }
 0x249   :  { %866 = vmatprep.subr.bf16.mxu0 %v2017_v15  ;;  %907 = vmatprep.subr.bf16.mxu1 %v2020_v16 }
 0x24c   :  { %867 = vmatpush1.bf16.msra.mxu0 %v2023_v17  ;;  %908 = vmatpush1.bf16.msra.mxu1 %v2025_v18 }
 0x24d   :  { %868 = vmatprep.subr.bf16.mxu0 %v2029_v19  ;;  %909 = vmatprep.subr.bf16.mxu1 %v2032_v20 }
 0x250   :  { %869 = vmatpush1.bf16.msra.mxu0 %v2036_v21  ;;  %910 = vmatpush1.bf16.msra.mxu1 %v2039_v22 }
 0x251   :  { %870 = vmatprep.subr.bf16.mxu0 %v2044_v23  ;;  %911 = vmatprep.subr.bf16.mxu1 %v2048_v24 }
 0x254   :  { %871 = vmatpush1.bf16.msra.mxu0 %v2054_v26  ;;  %912 = vmatpush1.bf16.msra.mxu1 %v2058_v27 }
 0x255   :  { %872 = vmatprep.subr.bf16.mxu0 %v2060_v28  ;;  %913 = vmatprep.subr.bf16.mxu1 %v2063_v29 }
 0x258   :  { %873 = vmatpush1.bf16.msra.mxu0 %v2068_v30  ;;  %914 = vmatpush1.bf16.msra.mxu1 %v2070_v31 }
 0x259   :  { %874 = vmatprep.subr.bf16.mxu0 %v2078_v33  ;;  %915 = vmatprep.subr.bf16.mxu1 %v2082_v34 }
 0x25c   :  { %875 = vmatpush1.bf16.msra.mxu0 %v2084_v35  ;;  %916 = vmatpush1.bf16.msra.mxu1 %v2086_v36 }
 0x25d   :  { %876 = vmatprep.subr.bf16.mxu0 %v2088_v37  ;;  %917 = vmatprep.subr.bf16.mxu1 %v2091_v38 }
 0x260   :  { %877 = vmatpush1.bf16.msra.mxu0 %v2096_v39  ;;  %918 = vmatpush1.bf16.msra.mxu1 %v2104_v40 }
 0x261   :  { %974 = vmatprep.subr.bf16.mxu0 %v1989_v6  ;;  %1015 = vmatprep.subr.bf16.mxu1 %v1991_v7 }
 0x316   :  { %v784_v62 = vpop.f32.mrb[24].mxu0  ;;  %v825_v58 = vpop.f32.mrb[24].mxu1 }
 0x317   :  { %v832_v3 = vadd.f32 %v784_v62, %v2167_v4  ;;  %v834_v50 = vadd.f32 %v825_v58, %v2170_v14  ;;  %v786_v49 = vpop.f32.mrb[25].mxu0  ;;  %v827_v51 = vpop.f32.mrb[25].mxu1 }
 0x318   :  { %v833_v53 = vadd.f32 %v786_v49, %v2172_v32  ;;  %v835_v54 = vadd.f32 %v827_v51, %v2575_v52  ;;  %v788_v55 = vpop.f32.mrb[26].mxu0  ;;  %v829_v56 = vpop.f32.mrb[26].mxu1  ;;  %v2577_v51 = vld [vmem:[#allocation16_spill] sm:$0xff] }
 0x319   :  { %v836_v0 = vmul.f32 0.5, %v832_v3  ;;  %v789_v57 = vpop.f32.mrb[27].mxu0  ;;  %v830_v59 = vpop.f32.mrb[27].mxu1  ;;  %v2578_v55 = vld [vmem:[#allocation17_spill] sm:$0xff] }
 0x31a   :  { %v840_v5 = vmul.f32 0.5, %v833_v53  ;;  %v845_v61 = vmul.f32 0.5, %v835_v54 }
 0x31b   :  { %1738 = vtanh.f32 %v836_v0  ;;  %v2579_v0 = vld [vmem:[#allocation18_spill] sm:$0xff] }
 0x31c   :  { %1740 = vtanh.f32 %v840_v5 }
 0x31d   :  { %1742 = vtanh.f32 %v834_v50  ;;  %v2576_v50 = vld [vmem:[#allocation15_spill] sm:$0xff] }
 0x31e   :  { %1744 = vtanh.f32 %v845_v61 }
 0x325   :  { %v1739_v46 = vpop.eup %1738 }
 0x326   :  { %v1741_v4 = vpop.eup %1740  ;;  %v838_v60 = vmul.f32 0.5, %v1739_v46 }
 0x327   :  { %v842_v14 = vmul.f32 0.5, %v1741_v4  ;;  %v1743_v25 = vpop.eup %1742 }
 0x328   :  { %v839_v63 = vadd.f32 0.5, %v838_v60  ;;  %v1745_v48 = vpop.eup %1744 }
 0x329   :  { %v843_v32 = vadd.f32 0.5, %v842_v14  ;;  %v847_v41 = vmul.f32 0.5, %v1745_v48 }
 0x32a   :  { %v850_v1 = vmul.f32 %v1743_v25, %v839_v63 }
 0x32b   :  { %v849_v45 = vmul.f32 %v843_v32, %v2273_v42  ;;  %v848_v43 = vadd.f32 0.5, %v847_v41 }
 0x32d   :  { %v2315_v44 = vadd.f32 %v850_v1, %v849_v45 }
 0x32f   :  { %1746 = vtanh.f32 %v2315_v44 }
 0x339   :  { %v1747_v47 = vpop.eup %1746 }
 0x33a   :  { %v853_v62 = vmul.f32 %v1747_v47, %v848_v43 }
 0x33c   :  { %v861_v58 = vpack.c.bf16 %v853_v62, %v853_v62 }
 0x33e   :  { %895 = vmatmul.mubr.bf16.vlgmr.msra.gmra.mrb[28].mxu0 %v861_v58  ;;  %936 = vmatmul.mubr.bf16.vlgmr.msra.gmra.mrb[28].mxu1 %v861_v58 }
 0x33f   :  { %975 = vmatpush1.bf16.msra.mxu0 %v1993_v8  ;;  %1016 = vmatpush1.bf16.msra.mxu1 %v1996_v9 }
 0x340   :  { %976 = vmatprep.subr.bf16.mxu0 %v2000_v10  ;;  %1017 = vmatprep.subr.bf16.mxu1 %v2004_v11 }
 0x341   :  { %1006 = vmatprep.mubr.bf16.mxu0 %v2574_v2  ;;  %1047 = vmatprep.mubr.bf16.mxu1 %v2574_v2 }
 0x343   :  { %977 = vmatpush1.bf16.msra.mxu0 %v2006_v12  ;;  %1018 = vmatpush1.bf16.msra.mxu1 %v2008_v13 }
 0x344   :  { %978 = vmatprep.subr.bf16.mxu0 %v2017_v15  ;;  %1019 = vmatprep.subr.bf16.mxu1 %v2020_v16 }
 0x347   :  { %979 = vmatpush1.bf16.msra.mxu0 %v2023_v17  ;;  %1020 = vmatpush1.bf16.msra.mxu1 %v2025_v18 }
 0x348   :  { %980 = vmatprep.subr.bf16.mxu0 %v2029_v19  ;;  %1021 = vmatprep.subr.bf16.mxu1 %v2032_v20 }
 0x34b   :  { %981 = vmatpush1.bf16.msra.mxu0 %v2036_v21  ;;  %1022 = vmatpush1.bf16.msra.mxu1 %v2039_v22 }
 0x34c   :  { %982 = vmatprep.subr.bf16.mxu0 %v2044_v23  ;;  %1023 = vmatprep.subr.bf16.mxu1 %v2048_v24 }
 0x34f   :  { %983 = vmatpush1.bf16.msra.mxu0 %v2054_v26  ;;  %1024 = vmatpush1.bf16.msra.mxu1 %v2058_v27 }
 0x350   :  { %984 = vmatprep.subr.bf16.mxu0 %v2060_v28  ;;  %1025 = vmatprep.subr.bf16.mxu1 %v2063_v29 }
 0x353   :  { %985 = vmatpush1.bf16.msra.mxu0 %v2068_v30  ;;  %1026 = vmatpush1.bf16.msra.mxu1 %v2070_v31 }
 0x354   :  { %986 = vmatprep.subr.bf16.mxu0 %v2078_v33  ;;  %1027 = vmatprep.subr.bf16.mxu1 %v2082_v34 }
 0x357   :  { %987 = vmatpush1.bf16.msra.mxu0 %v2084_v35  ;;  %1028 = vmatpush1.bf16.msra.mxu1 %v2086_v36 }
 0x358   :  { %988 = vmatprep.subr.bf16.mxu0 %v2088_v37  ;;  %1029 = vmatprep.subr.bf16.mxu1 %v2091_v38 }
 0x35b   :  { %989 = vmatpush1.bf16.msra.mxu0 %v2096_v39  ;;  %1030 = vmatpush1.bf16.msra.mxu1 %v2104_v40 }
 0x35c   :  { %1086 = vmatprep.subr.bf16.mxu0 %v1989_v6  ;;  %1127 = vmatprep.subr.bf16.mxu1 %v1991_v7 }
 0x411   :  { %v896_v42 = vpop.f32.mrb[28].mxu0  ;;  %v937_v3 = vpop.f32.mrb[28].mxu1 }
 0x412   :  { %v944_v49 = vadd.f32 %v896_v42, %v2576_v50  ;;  %v946_v53 = vadd.f32 %v937_v3, %v2577_v51  ;;  %v898_v52 = vpop.f32.mrb[29].mxu0  ;;  %v939_v54 = vpop.f32.mrb[29].mxu1 }
 0x413   :  { %v945_v56 = vadd.f32 %v898_v52, %v2578_v55  ;;  %v947_v57 = vadd.f32 %v939_v54, %v2579_v0  ;;  %v900_v59 = vpop.f32.mrb[30].mxu0  ;;  %v941_v5 = vpop.f32.mrb[30].mxu1 }
 0x414   :  { %v948_v61 = vmul.f32 0.5, %v944_v49  ;;  %v901_v46 = vpop.f32.mrb[31].mxu0  ;;  %v942_v4 = vpop.f32.mrb[31].mxu1 }
 0x415   :  { %v952_v6 = vmul.f32 0.5, %v945_v56  ;;  %v957_v7 = vmul.f32 0.5, %v947_v57 }
 0x416   :  { %1748 = vtanh.f32 %v948_v61 }
 0x417   :  { %1750 = vtanh.f32 %v952_v6  ;;  %v2406_v6 = vld [vmem:[#allocation5] ss:$16 sps:$4 sm:$0xff]  }
 0x418   :  { %1752 = vtanh.f32 %v946_v53 }
 0x419   :  { %1754 = vtanh.f32 %v957_v7  ;;  %v2409_v7 = vld [vmem:[#allocation5 + $0x8] ss:$16 sps:$4 sm:$0xff]  }
 0x420   :  { %v1749_v60 = vpop.eup %1748 }
 0x421   :  { %v1751_v14 = vpop.eup %1750  ;;  %v950_v63 = vmul.f32 0.5, %v1749_v60  ;;  %v2412_v60 = vld [vmem:[#allocation5 + $0x24] ss:$16 sps:$4 sm:$0xff]  }
 0x422   :  { %v954_v25 = vmul.f32 0.5, %v1751_v14  ;;  %v1753_v1 = vpop.eup %1752  ;;  %v2415_v14 = vld [vmem:[#allocation5 + $0x2c] ss:$16 sps:$4 sm:$0xff]  }
 0x423   :  { %v951_v32 = vadd.f32 0.5, %v950_v63  ;;  %v1755_v47 = vpop.eup %1754  ;;  %v2420_v63 = vld [vmem:[#allocation5 + $0x20] ss:$16 sps:$4 sm:$0xff]  }
 0x424   :  { %v955_v45 = vadd.f32 0.5, %v954_v25  ;;  %v959_v62 = vmul.f32 0.5, %v1755_v47  ;;  %v2423_v25 = vld [vmem:[#allocation5 + $0x28] ss:$16 sps:$4 sm:$0xff]   ;;  %v2444_v47 = vld [vmem:[#allocation5 + $0x60] ss:$16 sps:$4 sm:$0xff]  }
 0x425   :  { %v962_v48 = vmul.f32 %v1753_v1, %v951_v32  ;;  %v2426_v32 = vld [vmem:[#allocation5 + $0x44] ss:$16 sps:$4 sm:$0xff]   ;;  %v2429_v1 = vld [vmem:[#allocation5 + $0x4c] ss:$16 sps:$4 sm:$0xff]  }
 0x426   :  { %v961_v41 = vmul.f32 %v955_v45, %v2315_v44  ;;  %v960_v58 = vadd.f32 0.5, %v959_v62  ;;  %v2432_v45 = vld [vmem:[#allocation5 + $0x40] ss:$16 sps:$4 sm:$0xff]   ;;  %v2447_v62 = vld [vmem:[#allocation5 + $0x68] ss:$16 sps:$4 sm:$0xff]  }
 0x428   :  { %v2357_v43 = vadd.f32 %v962_v48, %v961_v41  ;;  %v2435_v48 = vld [vmem:[#allocation5 + $0x48] ss:$16 sps:$4 sm:$0xff]   ;;  %v2438_v41 = vld [vmem:[#allocation5 + $0x64] ss:$16 sps:$4 sm:$0xff]  }
 0x42a   :  { %1756 = vtanh.f32 %v2357_v43 }
 0x434   :  { %v1757_v42 = vpop.eup %1756 }
 0x435   :  { %v965_v3 = vmul.f32 %v1757_v42, %v960_v58  ;;  %v2450_v58 = vld [vmem:[#allocation5 + $0x84] ss:$16 sps:$4 sm:$0xff]   ;;  %v2453_v42 = vld [vmem:[#allocation5 + $0x8c] ss:$16 sps:$4 sm:$0xff]  }
 0x437   :  { %v973_v50 = vpack.c.bf16 %v965_v3, %v965_v3  ;;  %v2456_v3 = vld [vmem:[#allocation5 + $0x80] ss:$16 sps:$4 sm:$0xff]  }
 0x439   :  { %1007 = vmatmul.mubr.bf16.vlgmr.msra.gmra.mrb[32].mxu0 %v973_v50  ;;  %1048 = vmatmul.mubr.bf16.vlgmr.msra.gmra.mrb[32].mxu1 %v973_v50  ;;  %v2459_v50 = vld [vmem:[#allocation5 + $0x88] ss:$16 sps:$4 sm:$0xff]  }
 0x43a   :  { %1087 = vmatpush1.bf16.msra.mxu0 %v1993_v8  ;;  %1128 = vmatpush1.bf16.msra.mxu1 %v1996_v9  ;;  %v2392_v8 = vld [vmem:[#allocation5 + $0x4] ss:$16 sps:$4 sm:$0xff]   ;;  %v2395_v9 = vld [vmem:[#allocation5 + $0xc] ss:$16 sps:$4 sm:$0xff]  }
 0x43b   :  { %1088 = vmatprep.subr.bf16.mxu0 %v2000_v10  ;;  %1129 = vmatprep.subr.bf16.mxu1 %v2004_v11 }
 0x43c   :  { %1118 = vmatprep.mubr.bf16.mxu0 %v2574_v2  ;;  %1159 = vmatprep.mubr.bf16.mxu1 %v2574_v2 }
 0x43e   :  { %1089 = vmatpush1.bf16.msra.mxu0 %v2006_v12  ;;  %1130 = vmatpush1.bf16.msra.mxu1 %v2008_v13  ;;  %v2580_v12 = vld [vmem:[#allocation19_spill] sm:$0xff] }
 0x43f   :  { %1090 = vmatprep.subr.bf16.mxu0 %v2017_v15  ;;  %1131 = vmatprep.subr.bf16.mxu1 %v2020_v16  ;;  %v2581_v15 = vld [vmem:[#allocation20_spill] sm:$0xff] }
 0x442   :  { %1091 = vmatpush1.bf16.msra.mxu0 %v2023_v17  ;;  %1132 = vmatpush1.bf16.msra.mxu1 %v2025_v18 }
 0x443   :  { %1092 = vmatprep.subr.bf16.mxu0 %v2029_v19  ;;  %1133 = vmatprep.subr.bf16.mxu1 %v2032_v20  ;;  %v2582_v19 = vld [vmem:[#allocation21_spill] sm:$0xff] }
 0x446   :  { %1093 = vmatpush1.bf16.msra.mxu0 %v2036_v21  ;;  %1134 = vmatpush1.bf16.msra.mxu1 %v2039_v22  ;;  %v2583_v21 = vld [vmem:[#allocation22_spill] sm:$0xff] }
 0x447   :  { %1094 = vmatprep.subr.bf16.mxu0 %v2044_v23  ;;  %1135 = vmatprep.subr.bf16.mxu1 %v2048_v24 }
 0x44a   :  { %1095 = vmatpush1.bf16.msra.mxu0 %v2054_v26  ;;  %1136 = vmatpush1.bf16.msra.mxu1 %v2058_v27 }
 0x44b   :  { %1096 = vmatprep.subr.bf16.mxu0 %v2060_v28  ;;  %1137 = vmatprep.subr.bf16.mxu1 %v2063_v29 }
 0x44e   :  { %1097 = vmatpush1.bf16.msra.mxu0 %v2068_v30  ;;  %1138 = vmatpush1.bf16.msra.mxu1 %v2070_v31 }
 0x44f   :  { %1098 = vmatprep.subr.bf16.mxu0 %v2078_v33  ;;  %1139 = vmatprep.subr.bf16.mxu1 %v2082_v34 }
 0x452   :  { %1099 = vmatpush1.bf16.msra.mxu0 %v2084_v35  ;;  %1140 = vmatpush1.bf16.msra.mxu1 %v2086_v36 }
 0x453   :  { %1100 = vmatprep.subr.bf16.mxu0 %v2088_v37  ;;  %1141 = vmatprep.subr.bf16.mxu1 %v2091_v38 }
 0x456   :  { %1101 = vmatpush1.bf16.msra.mxu0 %v2096_v39  ;;  %1142 = vmatpush1.bf16.msra.mxu1 %v2104_v40 }
 0x457   :  { %1198 = vmatprep.subr.bf16.mxu0 %v2392_v8  ;;  %1239 = vmatprep.subr.bf16.mxu1 %v2395_v9 }
 0x50c   :  { %v1008_v10 = vpop.f32.mrb[32].mxu0  ;;  %v1049_v11 = vpop.f32.mrb[32].mxu1 }
 0x50d   :  { %v1056_v13 = vadd.f32 %v1008_v10, %v2580_v12  ;;  %v1058_v16 = vadd.f32 %v1049_v11, %v2581_v15  ;;  %v1010_v17 = vpop.f32.mrb[33].mxu0  ;;  %v1051_v18 = vpop.f32.mrb[33].mxu1  ;;  %v2462_v10 = vld [vmem:[#allocation5 + $0xa4] ss:$16 sps:$4 sm:$0xff]   ;;  %v2465_v11 = vld [vmem:[#allocation5 + $0xac] ss:$16 sps:$4 sm:$0xff]  }
 0x50e   :  { %v1057_v20 = vadd.f32 %v1010_v17, %v2582_v19  ;;  %v1059_v22 = vadd.f32 %v1051_v18, %v2583_v21  ;;  %v1012_v23 = vpop.f32.mrb[34].mxu0  ;;  %v1053_v24 = vpop.f32.mrb[34].mxu1  ;;  %v2468_v12 = vld [vmem:[#allocation5 + $0xa0] ss:$16 sps:$4 sm:$0xff]   ;;  %v2585_v17 = vld [vmem:[#allocation24_spill] sm:$0xff] }
 0x50f   :  { %v1060_v26 = vmul.f32 0.5, %v1056_v13  ;;  %v1013_v27 = vpop.f32.mrb[35].mxu0  ;;  %v1054_v28 = vpop.f32.mrb[35].mxu1  ;;  %v2471_v13 = vld [vmem:[#allocation5 + $0xa8] ss:$16 sps:$4 sm:$0xff]   ;;  %v2586_v19 = vld [vmem:[#allocation25_spill] sm:$0xff] }
 0x510   :  { %v1064_v29 = vmul.f32 0.5, %v1057_v20  ;;  %v1069_v30 = vmul.f32 0.5, %v1059_v22  ;;  %v2587_v20 = vld [vmem:[#allocation26_spill] sm:$0xff] }
 0x511   :  { %1758 = vtanh.f32 %v1060_v26 }
 0x512   :  { %1760 = vtanh.f32 %v1064_v29 }
 0x513   :  { %1762 = vtanh.f32 %v1058_v16  ;;  %v2584_v16 = vld [vmem:[#allocation23_spill] sm:$0xff] }
 0x514   :  { %1764 = vtanh.f32 %v1069_v30 }
 0x51b   :  { %v1759_v31 = vpop.eup %1758 }
 0x51c   :  { %v1761_v44 = vpop.eup %1760  ;;  %v1062_v49 = vmul.f32 0.5, %v1759_v31 }
 0x51d   :  { %v1066_v51 = vmul.f32 0.5, %v1761_v44  ;;  %v1763_v52 = vpop.eup %1762 }
 0x51e   :  { %v1063_v53 = vadd.f32 0.5, %v1062_v49  ;;  %v1765_v57 = vpop.eup %1764 }
 0x51f   :  { %v1067_v54 = vadd.f32 0.5, %v1066_v51  ;;  %v1071_v59 = vmul.f32 0.5, %v1765_v57 }
 0x520   :  { %v1074_v55 = vmul.f32 %v1763_v52, %v1063_v53 }
 0x521   :  { %v1073_v56 = vmul.f32 %v1067_v54, %v2357_v43  ;;  %v1072_v5 = vadd.f32 0.5, %v1071_v59  ;;  %v2441_v43 = vld [vmem:[#allocation5 + $0x6c] ss:$16 sps:$4 sm:$0xff]   ;;  %v1824_v59 = vld [vmem:[#allocation5 + $0xc0] ss:$16 sps:$4 sm:$0xff]  }
 0x523   :  { %v2403_v0 = vadd.f32 %v1074_v55, %v1073_v56 }
 0x525   :  { %1766 = vtanh.f32 %v2403_v0 }
 0x52f   :  { %v1767_v61 = vpop.eup %1766 }
 0x530   :  { %v1077_v46 = vmul.f32 %v1767_v61, %v1072_v5  ;;  %v1825_v5 = vld [vmem:[#allocation5 + $0xc8] ss:$16 sps:$4 sm:$0xff]   ;;  %v1826_v61 = vld [vmem:[#allocation5 + $0xe4] ss:$16 sps:$4 sm:$0xff]  }
 0x532   :  { %v1085_v4 = vpack.c.bf16 %v1077_v46, %v1077_v46  ;;  %v1827_v46 = vld [vmem:[#allocation5 + $0xec] ss:$16 sps:$4 sm:$0xff]  }
 0x534   :  { %1119 = vmatmul.mubr.bf16.vlgmr.msra.gmra.mrb[36].mxu0 %v1085_v4  ;;  %1160 = vmatmul.mubr.bf16.vlgmr.msra.gmra.mrb[36].mxu1 %v1085_v4  ;;  %v1828_v4 = vld [vmem:[#allocation5 + $0xe0] ss:$16 sps:$4 sm:$0xff]  }
 0x535   :  { %1199 = vmatpush1.bf16.msra.mxu0 %v2406_v6  ;;  %1240 = vmatpush1.bf16.msra.mxu1 %v2409_v7 }
 0x536   :  { %1200 = vmatprep.subr.bf16.mxu0 %v2412_v60  ;;  %1241 = vmatprep.subr.bf16.mxu1 %v2415_v14 }
 0x537   :  { %1230 = vmatprep.mubr.bf16.mxu0 %v2574_v2  ;;  %1271 = vmatprep.mubr.bf16.mxu1 %v2574_v2 }
 0x539   :  { %1201 = vmatpush1.bf16.msra.mxu0 %v2420_v63  ;;  %1242 = vmatpush1.bf16.msra.mxu1 %v2423_v25 }
 0x53a   :  { %1202 = vmatprep.subr.bf16.mxu0 %v2426_v32  ;;  %1243 = vmatprep.subr.bf16.mxu1 %v2429_v1 }
 0x53d   :  { %1203 = vmatpush1.bf16.msra.mxu0 %v2432_v45  ;;  %1244 = vmatpush1.bf16.msra.mxu1 %v2435_v48 }
 0x53e   :  { %1204 = vmatprep.subr.bf16.mxu0 %v2438_v41  ;;  %1245 = vmatprep.subr.bf16.mxu1 %v2441_v43 }
 0x541   :  { %1205 = vmatpush1.bf16.msra.mxu0 %v2444_v47  ;;  %1246 = vmatpush1.bf16.msra.mxu1 %v2447_v62 }
 0x542   :  { %1206 = vmatprep.subr.bf16.mxu0 %v2450_v58  ;;  %1247 = vmatprep.subr.bf16.mxu1 %v2453_v42 }
 0x545   :  { %1207 = vmatpush1.bf16.msra.mxu0 %v2456_v3  ;;  %1248 = vmatpush1.bf16.msra.mxu1 %v2459_v50 }
 0x546   :  { %1208 = vmatprep.subr.bf16.mxu0 %v2462_v10  ;;  %1249 = vmatprep.subr.bf16.mxu1 %v2465_v11 }
 0x549   :  { %1209 = vmatpush1.bf16.msra.mxu0 %v2468_v12  ;;  %1250 = vmatpush1.bf16.msra.mxu1 %v2471_v13 }
 0x54a   :  { %1210 = vmatprep.subr.bf16.mxu0 %v2078_v33  ;;  %1251 = vmatprep.subr.bf16.mxu1 %v2082_v34 }
 0x54d   :  { %1211 = vmatpush1.bf16.msra.mxu0 %v2084_v35  ;;  %1252 = vmatpush1.bf16.msra.mxu1 %v2086_v36 }
 0x54e   :  { %1212 = vmatprep.subr.bf16.mxu0 %v2088_v37  ;;  %1253 = vmatprep.subr.bf16.mxu1 %v2091_v38 }
 0x551   :  { %1213 = vmatpush1.bf16.msra.mxu0 %v2096_v39  ;;  %1254 = vmatpush1.bf16.msra.mxu1 %v2104_v40 }
 0x552   :  { %1310 = vmatprep.subr.bf16.mxu0 %v2392_v8  ;;  %1351 = vmatprep.subr.bf16.mxu1 %v2395_v9 }
 0x607   :  { %v1120_v15 = vpop.f32.mrb[36].mxu0  ;;  %v1161_v33 = vpop.f32.mrb[36].mxu1 }
 0x608   :  { %v1168_v34 = vadd.f32 %v1120_v15, %v2584_v16  ;;  %v1170_v35 = vadd.f32 %v1161_v33, %v2585_v17  ;;  %v1122_v18 = vpop.f32.mrb[37].mxu0  ;;  %v1163_v36 = vpop.f32.mrb[37].mxu1 }
 0x609   :  { %v1169_v37 = vadd.f32 %v1122_v18, %v2586_v19  ;;  %v1171_v38 = vadd.f32 %v1163_v36, %v2587_v20  ;;  %v1124_v21 = vpop.f32.mrb[38].mxu0  ;;  %v1165_v39 = vpop.f32.mrb[38].mxu1 }
 0x60a   :  { %v1172_v22 = vmul.f32 0.5, %v1168_v34  ;;  %v1125_v40 = vpop.f32.mrb[39].mxu0  ;;  %v1166_v23 = vpop.f32.mrb[39].mxu1 }
 0x60b   :  { %v1176_v8 = vmul.f32 0.5, %v1169_v37  ;;  %v1181_v9 = vmul.f32 0.5, %v1171_v38  ;;  %v1910_v40 = vmov 0.0   ;;  %v1711_v23 = vld [vmem:[#allocation8 + $0x8] sm:$0xff]  }
 0x60c   :  { %1768 = vtanh.f32 %v1172_v22  ;;  %v1710_v22 = vld [vmem:[#allocation8] sm:$0xff]  }
 0x60d   :  { %1770 = vtanh.f32 %v1176_v8  ;;  %v1712_v8 = vld [vmem:[#allocation8 + $0x10] sm:$0xff]  }
 0x60e   :  { %1772 = vtanh.f32 %v1170_v35 }
 0x60f   :  { %1774 = vtanh.f32 %v1181_v9  ;;  %v1713_v9 = vld [vmem:[#allocation8 + $0x18] sm:$0xff]  }
 0x616   :  { %v1769_v24 = vpop.eup %1768 }
 0x617   :  { %v1771_v26 = vpop.eup %1770  ;;  %v1174_v27 = vmul.f32 0.5, %v1769_v24  ;;  %v1714_v24 = vld [vmem:[#allocation8 + $0x20] sm:$0xff]  }
 0x618   :  { %v1178_v28 = vmul.f32 0.5, %v1771_v26  ;;  %v1773_v30 = vpop.eup %1772  ;;  %v1715_v26 = vld [vmem:[#allocation8 + $0x28] sm:$0xff]  }
 0x619   :  { %v1175_v29 = vadd.f32 0.5, %v1174_v27  ;;  %v1775_v53 = vpop.eup %1774  ;;  %v1716_v27 = vld [vmem:[#allocation8 + $0x30] sm:$0xff]  }
 0x61a   :  { %v1179_v31 = vadd.f32 0.5, %v1178_v28  ;;  %v1183_v52 = vmul.f32 0.5, %v1775_v53  ;;  %v1717_v28 = vld [vmem:[#allocation8 + $0x38] sm:$0xff]  }
 0x61b   :  { %v1186_v44 = vmul.f32 %v1773_v30, %v1175_v29 }
 0x61c   :  { %v1185_v49 = vmul.f32 %v1179_v31, %v2403_v0  ;;  %v1184_v54 = vadd.f32 0.5, %v1183_v52  ;;  %v1823_v0 = vld [vmem:[#allocation5 + $0xcc] ss:$16 sps:$4 sm:$0xff]   ;;  %v2592_v31 = vld [vmem:[#allocation31_spill] sm:$0xff] }
 0x61e   :  { %v2489_v51 = vadd.f32 %v1186_v44, %v1185_v49  ;;  %v2593_v49 = vld [vmem:[#allocation32_spill] sm:$0xff] }
 0x620   :  { %1776 = vtanh.f32 %v2489_v51 }
 0x62a   :  { %v1777_v55 = vpop.eup %1776 }
 0x62b   :  { %v1189_v56 = vmul.f32 %v1777_v55, %v1184_v54  ;;  %v2594_v54 = vld [vmem:[#allocation33_spill] sm:$0xff] }
 0x62d   :  { %v1197_v57 = vpack.c.bf16 %v1189_v56, %v1189_v56  ;;  %v2595_v56 = vld [vmem:[#allocation34_spill] sm:$0xff] }
 0x62f   :  { %1231 = vmatmul.mubr.bf16.vlgmr.msra.gmra.mrb[40].mxu0 %v1197_v57  ;;  %1272 = vmatmul.mubr.bf16.vlgmr.msra.gmra.mrb[40].mxu1 %v1197_v57 }
 0x630   :  { %1311 = vmatpush1.bf16.msra.mxu0 %v2406_v6  ;;  %1352 = vmatpush1.bf16.msra.mxu1 %v2409_v7  ;;  %v1829_v6 = vld [vmem:[#allocation5 + $0xe8] ss:$16 sps:$4 sm:$0xff]  }
 0x631   :  { %1312 = vmatprep.subr.bf16.mxu0 %v2412_v60  ;;  %1353 = vmatprep.subr.bf16.mxu1 %v2415_v14  ;;  %v2588_v14 = vld [vmem:[#allocation27_spill] sm:$0xff] }
 0x632   :  { %1342 = vmatprep.mubr.bf16.mxu0 %v2574_v2  ;;  %1383 = vmatprep.mubr.bf16.mxu1 %v2574_v2  ;;  %v1822_v2 = vld [vmem:[#allocation5 + $0xc4] ss:$16 sps:$4 sm:$0xff]  }
 0x634   :  { %1313 = vmatpush1.bf16.msra.mxu0 %v2420_v63  ;;  %1354 = vmatpush1.bf16.msra.mxu1 %v2423_v25  ;;  %v2589_v25 = vld [vmem:[#allocation28_spill] sm:$0xff] }
 0x635   :  { %1314 = vmatprep.subr.bf16.mxu0 %v2426_v32  ;;  %1355 = vmatprep.subr.bf16.mxu1 %v2429_v1 }
 0x638   :  { %1315 = vmatpush1.bf16.msra.mxu0 %v2432_v45  ;;  %1356 = vmatpush1.bf16.msra.mxu1 %v2435_v48  ;;  %v2590_v48 = vld [vmem:[#allocation29_spill] sm:$0xff] }
 0x639   :  { %1316 = vmatprep.subr.bf16.mxu0 %v2438_v41  ;;  %1357 = vmatprep.subr.bf16.mxu1 %v2441_v43  ;;  %v2591_v43 = vld [vmem:[#allocation30_spill] sm:$0xff] }
 0x63c   :  { %1317 = vmatpush1.bf16.msra.mxu0 %v2444_v47  ;;  %1358 = vmatpush1.bf16.msra.mxu1 %v2447_v62 }
 0x63d   :  { %1318 = vmatprep.subr.bf16.mxu0 %v2450_v58  ;;  %1359 = vmatprep.subr.bf16.mxu1 %v2453_v42 }
 0x640   :  { %1319 = vmatpush1.bf16.msra.mxu0 %v2456_v3  ;;  %1360 = vmatpush1.bf16.msra.mxu1 %v2459_v50 }
 0x641   :  { %1320 = vmatprep.subr.bf16.mxu0 %v2462_v10  ;;  %1361 = vmatprep.subr.bf16.mxu1 %v2465_v11 }
 0x644   :  { %1321 = vmatpush1.bf16.msra.mxu0 %v2468_v12  ;;  %1362 = vmatpush1.bf16.msra.mxu1 %v2471_v13 }
 0x645   :  { %1322 = vmatprep.subr.bf16.mxu0 %v1822_v2  ;;  %1363 = vmatprep.subr.bf16.mxu1 %v1823_v0 }
 0x648   :  { %1323 = vmatpush1.bf16.msra.mxu0 %v1824_v59  ;;  %1364 = vmatpush1.bf16.msra.mxu1 %v1825_v5 }
 0x649   :  { %1324 = vmatprep.subr.bf16.mxu0 %v1826_v61  ;;  %1365 = vmatprep.subr.bf16.mxu1 %v1827_v46 }
 0x64c   :  { %1325 = vmatpush1.bf16.msra.mxu0 %v1828_v4  ;;  %1366 = vmatpush1.bf16.msra.mxu1 %v1829_v6 }
 0x64d   :  { %1621 = vmatprep.subr.bf16.mxu0 %v1910_v40 }
 0x702   :  { %v1232_v7 = vpop.f32.mrb[40].mxu0  ;;  %v1273_v60 = vpop.f32.mrb[40].mxu1 }
 0x703   :  { %v1280_v63 = vadd.f32 %v1232_v7, %v2588_v14  ;;  %v1282_v32 = vadd.f32 %v1273_v60, %v2589_v25  ;;  %v1234_v1 = vpop.f32.mrb[41].mxu0  ;;  %v1275_v45 = vpop.f32.mrb[41].mxu1 }
 0x704   :  { %v1281_v41 = vadd.f32 %v1234_v1, %v2590_v48  ;;  %v1283_v47 = vadd.f32 %v1275_v45, %v2591_v43  ;;  %v1236_v62 = vpop.f32.mrb[42].mxu0  ;;  %v1277_v58 = vpop.f32.mrb[42].mxu1 }
 0x705   :  { %v1284_v42 = vmul.f32 0.5, %v1280_v63  ;;  %v1237_v3 = vpop.f32.mrb[43].mxu0  ;;  %v1278_v50 = vpop.f32.mrb[43].mxu1 }
 0x706   :  { %v1288_v10 = vmul.f32 0.5, %v1281_v41  ;;  %v1293_v11 = vmul.f32 0.5, %v1283_v47  ;;  %v1603_v3 = vld [vmem:[%s2549_s5] ss:$0 sm:$0xff] }
 0x707   :  { %1778 = vtanh.f32 %v1284_v42 }
 0x708   :  { %1780 = vtanh.f32 %v1288_v10 }
 0x709   :  { %1782 = vtanh.f32 %v1282_v32 }
 0x70a   :  { %1784 = vtanh.f32 %v1293_v11 }
 0x711   :  { %v1779_v12 = vpop.eup %1778 }
 0x712   :  { %v1781_v13 = vpop.eup %1780  ;;  %v1286_v15 = vmul.f32 0.5, %v1779_v12 }
 0x713   :  { %v1290_v33 = vmul.f32 0.5, %v1781_v13  ;;  %v1783_v34 = vpop.eup %1782 }
 0x714   :  { %v1287_v16 = vadd.f32 0.5, %v1286_v15  ;;  %v1785_v19 = vpop.eup %1784 }
 0x715   :  { %v1291_v17 = vadd.f32 0.5, %v1290_v33  ;;  %v1295_v37 = vmul.f32 0.5, %v1785_v19 }
 0x716   :  { %v1298_v35 = vmul.f32 %v1783_v34, %v1287_v16 }
 0x717   :  { %v1297_v18 = vmul.f32 %v1291_v17, %v2489_v51  ;;  %v1296_v20 = vadd.f32 0.5, %v1295_v37 }
 0x719   :  { %v2521_v36 = vadd.f32 %v1298_v35, %v1297_v18 }
 0x71b   :  { %1786 = vtanh.f32 %v2521_v36 }
 0x725   :  { %v1787_v38 = vpop.eup %1786 }
 0x726   :  { %v1301_v21 = vmul.f32 %v1787_v38, %v1296_v20 }
 0x728   :  { %v1309_v39 = vpack.c.bf16 %v1301_v21, %v1301_v21 }
 0x72a   :  { %1343 = vmatmul.mubr.bf16.vlgmr.msra.gmra.mrb[44].mxu0 %v1309_v39  ;;  %1384 = vmatmul.mubr.bf16.vlgmr.msra.gmra.mrb[44].mxu1 %v1309_v39 }
 0x72b   :  { %1622 = vmatpush3.bf16.msra.mxu0 %v1710_v22  ;;  %1637 = vmatprep.mubr.msk.bf16.mxu0 %vm1911_vm1, %v1910_v40 }
 0x72c   :  { %1623 = vmatprep.subr.bf16.mxu0 %v1910_v40 }
 0x72f   :  { %1624 = vmatpush3.bf16.msra.mxu0 %v1711_v23 }
 0x730   :  { %1625 = vmatprep.subr.bf16.mxu0 %v1910_v40 }
 0x733   :  { %1626 = vmatpush3.bf16.msra.mxu0 %v1712_v8 }
 0x734   :  { %1627 = vmatprep.subr.bf16.mxu0 %v1910_v40 }
 0x737   :  { %1628 = vmatpush3.bf16.msra.mxu0 %v1713_v9 }
 0x738   :  { %1629 = vmatprep.subr.bf16.mxu0 %v1910_v40 }
 0x73b   :  { %1630 = vmatpush3.bf16.msra.mxu0 %v1714_v24 }
 0x73c   :  { %1631 = vmatprep.subr.bf16.mxu0 %v1910_v40 }
 0x73f   :  { %1632 = vmatpush3.bf16.msra.mxu0 %v1715_v26 }
 0x740   :  { %1633 = vmatprep.subr.bf16.mxu0 %v1910_v40 }
 0x743   :  { %1634 = vmatpush3.bf16.msra.mxu0 %v1716_v27 }
 0x744   :  { %1635 = vmatprep.subr.bf16.mxu0 %v1910_v40 }
 0x747   :  { %1636 = vmatpush3.bf16.msra.mxu0 %v1717_v28 }
 0x7fd   :  { %v1344_v29 = vpop.f32.mrb[44].mxu0  ;;  %v1385_v30 = vpop.f32.mrb[44].mxu1 }
 0x7fe   :  { %v1392_v44 = vadd.f32 %v1344_v29, %v2592_v31  ;;  %v1394_v51 = vadd.f32 %v1385_v30, %v2593_v49  ;;  %v1346_v53 = vpop.f32.mrb[45].mxu0  ;;  %v1387_v52 = vpop.f32.mrb[45].mxu1 }
 0x7ff   :  { %v1393_v55 = vadd.f32 %v1346_v53, %v2594_v54  ;;  %v1395_v57 = vadd.f32 %v1387_v52, %v2595_v56  ;;  %v1348_v2 = vpop.f32.mrb[46].mxu0  ;;  %v1389_v0 = vpop.f32.mrb[46].mxu1 }
 0x800   :  { %v1396_v59 = vmul.f32 0.5, %v1392_v44  ;;  %v1349_v5 = vpop.f32.mrb[47].mxu0  ;;  %v1390_v61 = vpop.f32.mrb[47].mxu1 }
 0x801   :  { %v1400_v46 = vmul.f32 0.5, %v1393_v55  ;;  %v1405_v4 = vmul.f32 0.5, %v1395_v57 }
 0x802   :  { %1788 = vtanh.f32 %v1396_v59 }
 0x803   :  { %1790 = vtanh.f32 %v1400_v46 }
 0x804   :  { %1792 = vtanh.f32 %v1394_v51 }
 0x805   :  { %1794 = vtanh.f32 %v1405_v4 }
 0x80c   :  { %v1789_v6 = vpop.eup %1788 }
 0x80d   :  { %v1791_v7 = vpop.eup %1790  ;;  %v1398_v60 = vmul.f32 0.5, %v1789_v6 }
 0x80e   :  { %v1402_v14 = vmul.f32 0.5, %v1791_v7  ;;  %v1793_v25 = vpop.eup %1792 }
 0x80f   :  { %v1399_v63 = vadd.f32 0.5, %v1398_v60  ;;  %v1795_v41 = vpop.eup %1794 }
 0x810   :  { %v1403_v32 = vadd.f32 0.5, %v1402_v14  ;;  %v1407_v43 = vmul.f32 0.5, %v1795_v41 }
 0x811   :  { %v1410_v1 = vmul.f32 %v1793_v25, %v1399_v63 }
 0x812   :  { %v1409_v45 = vmul.f32 %v1403_v32, %v2521_v36  ;;  %v1408_v47 = vadd.f32 0.5, %v1407_v43 }
 0x814   :  { %v1411_v48 = vadd.f32 %v1410_v1, %v1409_v45 }
 0x816   :  { %1796 = vtanh.f32 %v1411_v48 }
 0x820   :  { %v1797_v62 = vpop.eup %1796 }
 0x821   :  { %v1413_v58 = vmul.f32 %v1797_v62, %v1408_v47 }
 0x823   :  { %v1419_v42 = vpack.c.bf16 %v1413_v58, %v1413_v58 }
 0x825   :  { %1638 = vmatmul.mubr.bf16.vlgmr.msra.gmra.mrb[48].mxu0 %v1419_v42 }
 0x8f8   :  { %v1525_v50 = vpop.f32.mrb[48].mxu0 }
 0x8f9   :  { %v1526_v10 = vadd.f32 %v1603_v3, %v1525_v50  ;;  %v1639_v11 = vpop.f32.mrb[49].mxu0 }
 0x8fa   :  { %v1528_v12 = vpop.f32.mrb[50].mxu0 }
 0x8fb   :  { %1531 = vst [vmem:[#allocation10] sm:$0xff] %v1526_v10  ;;  %v1640_v13 = vpop.f32.mrb[51].mxu0 }
 0x8fc   :  { %1885 = shalt.err (!%p1882_p6)
}
 0x8fd   :  { %s1886_s5 = scalar_lea.hbm %s2550_s6, 128 }
 0x8fe   :  { %p1887_p7 = scmp.ne.s32.totalorder %s2550_s6, %s1886_s5  ;;  %p1890_p8 = scmp.lt.u32.totalorder %s1886_s5, %s2550_s6 }
 0x900   :  { %p1892_p9 = pnand %p1890_p8, %p1887_p7 }
 0x902   :  { %1895 = shalt.err (!%p1892_p9)
}
 0x903   :  { %1541 = dma.vmem_to_hbm [thread:$0]  %s1539_s17, 128, %s2550_s6, [#allocation7]  }
 0x904   :  { %1900 = dma.done.wait [#allocation7], 128  }
 0x905   :  { %1901 = vsyncadd [#allocation7], 4294967168 }
 0x906   :  { %1545 = vsyncpa [#allocation6], 1 }
 0x907   :  { %1546 = vsyncpa [#allocation9], 1 }
 0x908   :  { %1547 = vsyncpa [#allocation7], 1 }

</bundles_post_ra>
